<compile_context>
chip_gen: v6e
topology: v6e:2x2x1
jax: 0.10.0
libtpu: 0.0.40
codegen_flags: <defaults>
</compile_context>

<pallas_src>
import jax
import jax.numpy as jnp
from jax.experimental import pallas as pl
from jax.experimental.pallas import tpu as pltpu

EPS = 1e-5
NUM_TURBINES = 32


def fastgcn_kernel(x_ref, adjT_ref, adjo_ref,
                   w1_ref, b1_ref, w2_ref, b2_ref, w3_ref, b3_ref,
                   o_ref):
    bf16 = jnp.bfloat16
    f32 = jnp.float32
    P, H, F = w1_ref.shape            # pairs per grid step, hidden, in-features
    M2 = adjT_ref.shape[0]            # 2 * n_nodes (two samples packed on lanes)
    adjT = adjT_ref[...]              # (2N, 2N) bf16, 2x2 block-diagonal

    # --- gc1 (reassociated: aggregate first since F < H) + folded BN1 + ReLU
    agg = jnp.dot(x_ref[...], adjT, preferred_element_type=f32)          # (P*F, 2N)
    h = jnp.einsum('phf,pfn->phn', w1_ref[...],
                   agg.astype(bf16).reshape(P, F, M2),
                   preferred_element_type=f32).reshape(P * H, M2)        # (P*H, 2N)
    h = jnp.maximum(h + b1_ref[...], 0.0).astype(bf16)

    # --- gc2 + folded BN2 + ReLU (dropout is identity in eval mode)
    s = jnp.einsum('pkh,phn->pkn', w2_ref[...], h.reshape(P, H, M2),
                   preferred_element_type=f32)                           # (P, H, 2N)
    h = jnp.dot(s.astype(bf16).reshape(P * H, M2), adjT,
                preferred_element_type=f32)                              # (P*H, 2N)
    h = jnp.maximum(h + b2_ref[...], 0.0).astype(bf16)

    # --- gc3: per-sample channel mix to one unit, then aggregate only the
    #     NUM_TURBINES output node rows
    s3 = jnp.einsum('poh,phn->pon', w3_ref[...], h.reshape(P, H, M2),
                    preferred_element_type=f32)                          # (P, 1, 2N)
    out = jnp.dot(s3.reshape(P, M2).astype(bf16), adjo_ref[...],
                  preferred_element_type=f32)                            # (P, 2*NT)
    o_ref[...] = (out + b3_ref[0])[None, :, :]


def prepare_fastgcn(adj, params, *, pairs_per_step):
    """Fold eval-mode BatchNorm into the GCN weights/biases and lay the
    operands out for the kernel.  Call ONCE per parameter set."""
    bf16, f32 = jnp.bfloat16, jnp.float32
    P = pairs_per_step
    F, H = params["w1"].shape
    NT = NUM_TURBINES

    def fold(w, b, g, be, m, v):
        scale = g * jax.lax.rsqrt(v + EPS)
        return w * scale[None, :], b * scale + (be - m * scale)

    w1f, b1f = fold(params["w1"], params["b1"], params["g1"], params["be1"],
                    params["m1"], params["v1"])
    w2f, b2f = fold(params["w2"], params["b2"], params["g2"], params["be2"],
                    params["m2"], params["v2"])

    eye2 = jnp.eye(2, dtype=f32)
    return {
        # two samples packed side by side on the 128-lane axis -> 2x2
        # block-diagonal adjacency (lane-dense vregs, full MXU result width)
        "adjT": jnp.kron(eye2, adj.T).astype(bf16),              # (2N, 2N)
        "adjo": jnp.kron(eye2, adj[:NT, :].T).astype(bf16),      # (2N, 2NT)
        # compact transposed weights, batched over the per-step pair dim
        # (no kron block-diagonal -> no wasted MXU MACs)
        "w1": jnp.broadcast_to(w1f.T[None], (P, H, F)).astype(bf16),
        "w2": jnp.broadcast_to(w2f.T[None], (P, H, H)).astype(bf16),
        "w3": jnp.broadcast_to(params["w3"].T[None], (P, 1, H)).astype(bf16),
        "b1": jnp.tile(b1f, P).reshape(P * H, 1).astype(f32),
        "b2": jnp.tile(b2f, P).reshape(P * H, 1).astype(f32),
        "b3": params["b3"].reshape(1).astype(f32),               # scalar -> SMEM
    }


def _forward_impl(x, ops, *, grid_steps):
    B, N, F = x.shape
    P, H, _ = ops["w1"].shape
    NT = ops["adjo"].shape[1] // 2
    M2 = 2 * N
    assert B == 2 * P * grid_steps, (B, P, grid_steps)

    # pack sample pairs side by side on the lane axis (channel-first layout):
    # row q*F+f holds channel f of samples (2q | 2q+1) over the 2N lanes
    xt = jnp.transpose(x, (0, 2, 1)).reshape(B // 2, 2, F, N)
    xp = jnp.transpose(xt, (0, 2, 1, 3)).reshape((B // 2) * F, M2)
    xp = xp.astype(jnp.bfloat16)

    in_specs = [
        pl.BlockSpec((P * F, M2), lambda b: (b, 0)),            # packed x tile
        pl.BlockSpec((M2, M2), lambda b: (0, 0)),               # blockdiag adj.T
        pl.BlockSpec((M2, 2 * NT), lambda b: (0, 0)),           # blockdiag adj[:NT].T
        pl.BlockSpec((P, H, F), lambda b: (0, 0, 0)),           # W1.T (BN folded)
        pl.BlockSpec((P * H, 1), lambda b: (0, 0)),             # b1   (BN folded)
        pl.BlockSpec((P, H, H), lambda b: (0, 0, 0)),           # W2.T (BN folded)
        pl.BlockSpec((P * H, 1), lambda b: (0, 0)),             # b2   (BN folded)
        pl.BlockSpec((P, 1, H), lambda b: (0, 0, 0)),           # W3.T
        pl.BlockSpec(memory_space=pltpu.MemorySpace.SMEM),      # b3 scalar
    ]
    out_spec = pl.BlockSpec((1, P, 2 * NT), lambda b: (b, 0, 0))

    # advisory cost estimate (useful MACs only)
    flops = 2 * B * (F * N * N + H * F * N + H * H * N + H * N * N
                     + H * N + N * NT)
    bytes_accessed = (2 * (B // 2 * F * M2 + M2 * M2 + M2 * 2 * NT
                           + P * H * (F + H + 1))
                      + 4 * (2 * P * H + 1 + B * NT))

    out3 = pl.pallas_call(
        fastgcn_kernel,
        out_shape=jax.ShapeDtypeStruct((grid_steps, P, 2 * NT), jnp.float32),
        grid_spec=pltpu.PrefetchScalarGridSpec(
            num_scalar_prefetch=0,
            grid=(grid_steps,),
            in_specs=in_specs,
            out_specs=out_spec,
        ),
        compiler_params=pltpu.CompilerParams(
            dimension_semantics=("parallel",)),
        cost_estimate=pl.CostEstimate(flops=flops, transcendentals=0,
                                      bytes_accessed=bytes_accessed),
    )(xp, ops["adjT"], ops["adjo"], ops["w1"], ops["b1"],
      ops["w2"], ops["b2"], ops["w3"], ops["b3"])

    return out3.reshape(B, NT)


fastgcn_forward = jax.jit(_forward_impl, static_argnames=("grid_steps",))


def default_grid_steps(batch):
    """1 grid step on single-TensorCore v5e/v6e, 2 'parallel' steps on
    dual-TensorCore v7x (one per core)."""
    try:
        kind = jax.devices()[0].device_kind.lower()
    except Exception:
        kind = ""
    steps = 2 if "7" in kind else 1
    return steps if batch % (2 * steps) == 0 else 1


def reference_forward(x, adj, params):
    def bn(h, g, be, m, v):
        return (h - m) * jax.lax.rsqrt(v + EPS) * g + be

    def one(xi):
        h = adj @ (xi @ params["w1"]) + params["b1"]
        h = jnp.maximum(bn(h, params["g1"], params["be1"], params["m1"], params["v1"]), 0.0)
        h = adj @ (h @ params["w2"]) + params["b2"]
        h = jnp.maximum(bn(h, params["g2"], params["be2"], params["m2"], params["v2"]), 0.0)
        o = adj @ (h @ params["w3"]) + params["b3"]
        return o[:NUM_TURBINES, 0]

    return jax.vmap(one)(x)


def xavier_uniform(key, fan_in, fan_out):
    bound = (6.0 / (fan_in + fan_out)) ** 0.5
    return jax.random.uniform(key, (fan_in, fan_out), jnp.float32, -bound, bound)


if __name__ == "__main__":
    B, N, F, H = 16, 64, 16, 32   # batch, n_nodes, nfeat, nhid (small synthetic sizes)

    key = jax.random.PRNGKey(0)
    ks = jax.random.split(key, 16)

    x = jax.random.normal(ks[0], (B, N, F), jnp.float32)

    # deterministic edge_index: self loops + ring edges (i -> (i+1) % N)
    src = jnp.concatenate([jnp.arange(N), jnp.arange(N)])
    dst = jnp.concatenate([jnp.arange(N), (jnp.arange(N) + 1) % N])
    # scatter_add: out[col] += support[row] * w  ->  dense A[col, row] += 1
    adj = jnp.zeros((N, N), jnp.float32).at[dst, src].add(1.0)

    params = {
        "w1": xavier_uniform(ks[1], F, H),
        "b1": 0.1 * jax.random.normal(ks[2], (H,), jnp.float32),
        "g1": jax.random.uniform(ks[3], (H,), jnp.float32, 0.5, 1.5),
        "be1": 0.1 * jax.random.normal(ks[4], (H,), jnp.float32),
        "m1": 0.1 * jax.random.normal(ks[5], (H,), jnp.float32),
        "v1": jax.random.uniform(ks[6], (H,), jnp.float32, 0.5, 1.5),
        "w2": xavier_uniform(ks[7], H, H),
        "b2": 0.1 * jax.random.normal(ks[8], (H,), jnp.float32),
        "g2": jax.random.uniform(ks[9], (H,), jnp.float32, 0.5, 1.5),
        "be2": 0.1 * jax.random.normal(ks[10], (H,), jnp.float32),
        "m2": 0.1 * jax.random.normal(ks[11], (H,), jnp.float32),
        "v2": jax.random.uniform(ks[12], (H,), jnp.float32, 0.5, 1.5),
        "w3": xavier_uniform(ks[13], H, 1),
        "b3": 0.1 * jax.random.normal(ks[14], (1,), jnp.float32),
    }

    grid_steps = default_grid_steps(B)
    pairs_per_step = B // (2 * grid_steps)

    ops = prepare_fastgcn(adj, params, pairs_per_step=pairs_per_step)  # once per param set
    out = jax.block_until_ready(fastgcn_forward(x, ops, grid_steps=grid_steps))
    ref = reference_forward(x, adj, params)

    assert out.shape == (B, NUM_TURBINES), out.shape
    # bf16 MXU inputs vs a pure-f32 reference -> allow ~1e-2-level deviation.
    assert jnp.allclose(out, ref, atol=5e-2, rtol=5e-2), \
        float(jnp.max(jnp.abs(out - ref)))

    print("KERNEL_OK")
</pallas_src>

<mosaic_0001>
module attributes {stable_mosaic.version = 11 : i64} {
  func.func @fastgcn_kernel(%arg0: i32, %arg1: memref<128x128xbf16, #tpu.memory_space<vmem>>, %arg2: memref<128x128xbf16, #tpu.memory_space<vmem>>, %arg3: memref<128x64xbf16, #tpu.memory_space<vmem>>, %arg4: memref<8x32x16xbf16, #tpu.memory_space<vmem>>, %arg5: memref<256x1xf32, #tpu.memory_space<vmem>>, %arg6: memref<8x32x32xbf16, #tpu.memory_space<vmem>>, %arg7: memref<256x1xf32, #tpu.memory_space<vmem>>, %arg8: memref<8x1x32xbf16, #tpu.memory_space<vmem>>, %arg9: memref<1xf32, #tpu.memory_space<smem>>, %arg10: memref<1x8x64xf32, #tpu.memory_space<vmem>>) attributes {dimension_semantics = [#tpu.dimension_semantics<parallel>], iteration_bounds = array<i64: 1>, scalar_prefetch = 0 : i64, scratch_operands = 0 : i64, tpu.core_type = #tpu.core_type<tc>, window_params = [{transform_indices = @transform_0, window_bounds = array<i64: 128, 128>}, {pipeline_mode = #tpu.pipeline_mode<synchronous>, transform_indices = @transform_1, window_bounds = array<i64: 128, 128>}, {pipeline_mode = #tpu.pipeline_mode<synchronous>, transform_indices = @transform_2, window_bounds = array<i64: 128, 64>}, {pipeline_mode = #tpu.pipeline_mode<synchronous>, transform_indices = @transform_3, window_bounds = array<i64: 8, 32, 16>}, {pipeline_mode = #tpu.pipeline_mode<synchronous>, transform_indices = @transform_4, window_bounds = array<i64: 256, 1>}, {pipeline_mode = #tpu.pipeline_mode<synchronous>, transform_indices = @transform_5, window_bounds = array<i64: 8, 32, 32>}, {pipeline_mode = #tpu.pipeline_mode<synchronous>, transform_indices = @transform_6, window_bounds = array<i64: 256, 1>}, {pipeline_mode = #tpu.pipeline_mode<synchronous>, transform_indices = @transform_7, window_bounds = array<i64: 8, 1, 32>}, {transform_indices = @transform_8, window_bounds = array<i64: 1>}, {transform_indices = @transform_9, window_bounds = array<i64: 1, 8, 64>}]} {
    %c0 = arith.constant 0 : index
    %c0_0 = arith.constant 0 : index
    %0 = vector.load %arg2[%c0, %c0_0] : memref<128x128xbf16, #tpu.memory_space<vmem>>, vector<128x128xbf16>
    %c0_1 = arith.constant 0 : index
    %c0_2 = arith.constant 0 : index
    %1 = vector.load %arg1[%c0_1, %c0_2] : memref<128x128xbf16, #tpu.memory_space<vmem>>, vector<128x128xbf16>
    %cst = arith.constant dense<0.000000e+00> : vector<128x128xf32>
    %2 = tpu.matmul %1, %0, %cst {dimension_numbers = #tpu.dot_dimension_numbers<[1], [0], [0], [1], [0, 0, 1, 1], [], []>} : vector<128x128xbf16>, vector<128x128xbf16>, vector<128x128xf32> -> vector<128x128xf32>
    %c0_3 = arith.constant 0 : index
    %c0_4 = arith.constant 0 : index
    %c0_5 = arith.constant 0 : index
    %3 = vector.load %arg4[%c0_3, %c0_4, %c0_5] : memref<8x32x16xbf16, #tpu.memory_space<vmem>>, vector<8x32x16xbf16>
    %4 = arith.truncf %2 : vector<128x128xf32> to vector<128x128xbf16>
    %5 = vector.shape_cast %4 : vector<128x128xbf16> to vector<8x16x128xbf16>
    "tpu.trace_start"() <{level = 10 : i32, message = "phf,pfn->phn"}> : () -> ()
    %cst_6 = arith.constant dense<0.000000e+00> : vector<8x32x128xf32>
    %6 = tpu.matmul %3, %5, %cst_6 {dimension_numbers = #tpu.dot_dimension_numbers<[2], [1], [1], [2], [0, 0, 0, 1, 1, 2], [0], [0]>} : vector<8x32x16xbf16>, vector<8x16x128xbf16>, vector<8x32x128xf32> -> vector<8x32x128xf32>
    "tpu.trace_stop"() : () -> ()
    %7 = vector.shape_cast %6 : vector<8x32x128xf32> to vector<256x128xf32>
    %c0_7 = arith.constant 0 : index
    %c0_8 = arith.constant 0 : index
    %8 = vector.load %arg5[%c0_7, %c0_8] : memref<256x1xf32, #tpu.memory_space<vmem>>, vector<256x1xf32>
    %9 = vector.broadcast %8 : vector<256x1xf32> to vector<256x128xf32>
    %10 = arith.addf %7, %9 : vector<256x128xf32>
    %cst_9 = arith.constant 0.000000e+00 : f32
    %11 = vector.broadcast %cst_9 : f32 to vector<256x128xf32>
    %12 = arith.maximumf %10, %11 : vector<256x128xf32>
    %13 = arith.truncf %12 : vector<256x128xf32> to vector<256x128xbf16>
    %c0_10 = arith.constant 0 : index
    %c0_11 = arith.constant 0 : index
    %c0_12 = arith.constant 0 : index
    %14 = vector.load %arg6[%c0_10, %c0_11, %c0_12] : memref<8x32x32xbf16, #tpu.memory_space<vmem>>, vector<8x32x32xbf16>
    %15 = vector.shape_cast %13 : vector<256x128xbf16> to vector<8x32x128xbf16>
    "tpu.trace_start"() <{level = 10 : i32, message = "pkh,phn->pkn"}> : () -> ()
    %cst_13 = arith.constant dense<0.000000e+00> : vector<8x32x128xf32>
    %16 = tpu.matmul %14, %15, %cst_13 {dimension_numbers = #tpu.dot_dimension_numbers<[2], [1], [1], [2], [0, 0, 0, 1, 1, 2], [0], [0]>} : vector<8x32x32xbf16>, vector<8x32x128xbf16>, vector<8x32x128xf32> -> vector<8x32x128xf32>
    "tpu.trace_stop"() : () -> ()
    %17 = arith.truncf %16 : vector<8x32x128xf32> to vector<8x32x128xbf16>
    %18 = vector.shape_cast %17 : vector<8x32x128xbf16> to vector<256x128xbf16>
    %cst_14 = arith.constant dense<0.000000e+00> : vector<256x128xf32>
    %19 = tpu.matmul %18, %0, %cst_14 {dimension_numbers = #tpu.dot_dimension_numbers<[1], [0], [0], [1], [0, 0, 1, 1], [], []>} : vector<256x128xbf16>, vector<128x128xbf16>, vector<256x128xf32> -> vector<256x128xf32>
    %c0_15 = arith.constant 0 : index
    %c0_16 = arith.constant 0 : index
    %20 = vector.load %arg7[%c0_15, %c0_16] : memref<256x1xf32, #tpu.memory_space<vmem>>, vector<256x1xf32>
    %21 = vector.broadcast %20 : vector<256x1xf32> to vector<256x128xf32>
    %22 = arith.addf %19, %21 : vector<256x128xf32>
    %cst_17 = arith.constant 0.000000e+00 : f32
    %23 = vector.broadcast %cst_17 : f32 to vector<256x128xf32>
    %24 = arith.maximumf %22, %23 : vector<256x128xf32>
    %25 = arith.truncf %24 : vector<256x128xf32> to vector<256x128xbf16>
    %c0_18 = arith.constant 0 : index
    %c0_19 = arith.constant 0 : index
    %c0_20 = arith.constant 0 : index
    %26 = vector.load %arg8[%c0_18, %c0_19, %c0_20] : memref<8x1x32xbf16, #tpu.memory_space<vmem>>, vector<8x1x32xbf16>
    %27 = vector.shape_cast %25 : vector<256x128xbf16> to vector<8x32x128xbf16>
    "tpu.trace_start"() <{level = 10 : i32, message = "poh,phn->pon"}> : () -> ()
    %cst_21 = arith.constant dense<0.000000e+00> : vector<8x1x128xf32>
    %28 = tpu.matmul %26, %27, %cst_21 {dimension_numbers = #tpu.dot_dimension_numbers<[2], [1], [1], [2], [0, 0, 0, 1, 1, 2], [0], [0]>} : vector<8x1x32xbf16>, vector<8x32x128xbf16>, vector<8x1x128xf32> -> vector<8x1x128xf32>
    "tpu.trace_stop"() : () -> ()
    %29 = vector.shape_cast %28 : vector<8x1x128xf32> to vector<8x128xf32>
    %30 = arith.truncf %29 : vector<8x128xf32> to vector<8x128xbf16>
    %c0_22 = arith.constant 0 : index
    %c0_23 = arith.constant 0 : index
    %31 = vector.load %arg3[%c0_22, %c0_23] : memref<128x64xbf16, #tpu.memory_space<vmem>>, vector<128x64xbf16>
    %cst_24 = arith.constant dense<0.000000e+00> : vector<8x64xf32>
    %32 = tpu.matmul %30, %31, %cst_24 {dimension_numbers = #tpu.dot_dimension_numbers<[1], [0], [0], [1], [0, 0, 1, 1], [], []>} : vector<8x128xbf16>, vector<128x64xbf16>, vector<8x64xf32> -> vector<8x64xf32>
    %c0_25 = arith.constant 0 : index
    %33 = memref.load %arg9[%c0_25] : memref<1xf32, #tpu.memory_space<smem>>
    %34 = vector.broadcast %33 : f32 to vector<8x64xf32>
    %35 = arith.addf %32, %34 : vector<8x64xf32>
    %36 = vector.shape_cast %35 : vector<8x64xf32> to vector<1x8x64xf32>
    %c0_26 = arith.constant 0 : index
    %c0_27 = arith.constant 0 : index
    %c0_28 = arith.constant 0 : index
    %37 = vector.load %arg10[%c0_26, %c0_27, %c0_28] : memref<1x8x64xf32, #tpu.memory_space<vmem>>, vector<1x8x64xf32>
    tpu.vector_store %arg10[%c0_26, %c0_27, %c0_28], %36 {strides = array<i32>} : memref<1x8x64xf32, #tpu.memory_space<vmem>>, vector<1x8x64xf32>,
    return
  }
  func.func @transform_0(%arg0: i32) -> (i32, i32) {
    %c0_i32 = arith.constant 0 : i32
    %c0_i32_0 = arith.constant 0 : i32
    return %arg0, %c0_i32 : i32, i32
  }
  func.func @transform_1(%arg0: i32) -> (i32, i32) {
    %c0_i32 = arith.constant 0 : i32
    %c0_i32_0 = arith.constant 0 : i32
    %c0_i32_1 = arith.constant 0 : i32
    return %c0_i32, %c0_i32_0 : i32, i32
  }
  func.func @transform_2(%arg0: i32) -> (i32, i32) {
    %c0_i32 = arith.constant 0 : i32
    %c0_i32_0 = arith.constant 0 : i32
    %c0_i32_1 = arith.constant 0 : i32
    return %c0_i32, %c0_i32_0 : i32, i32
  }
  func.func @transform_3(%arg0: i32) -> (i32, i32, i32) {
    %c0_i32 = arith.constant 0 : i32
    %c0_i32_0 = arith.constant 0 : i32
    %c0_i32_1 = arith.constant 0 : i32
    %c0_i32_2 = arith.constant 0 : i32
    return %c0_i32, %c0_i32_0, %c0_i32_1 : i32, i32, i32
  }
  func.func @transform_4(%arg0: i32) -> (i32, i32) {
    %c0_i32 = arith.constant 0 : i32
    %c0_i32_0 = arith.constant 0 : i32
    %c0_i32_1 = arith.constant 0 : i32
    return %c0_i32, %c0_i32_0 : i32, i32
  }
  func.func @transform_5(%arg0: i32) -> (i32, i32, i32) {
    %c0_i32 = arith.constant 0 : i32
    %c0_i32_0 = arith.constant 0 : i32
    %c0_i32_1 = arith.constant 0 : i32
    %c0_i32_2 = arith.constant 0 : i32
    return %c0_i32, %c0_i32_0, %c0_i32_1 : i32, i32, i32
  }
  func.func @transform_6(%arg0: i32) -> (i32, i32) {
    %c0_i32 = arith.constant 0 : i32
    %c0_i32_0 = arith.constant 0 : i32
    %c0_i32_1 = arith.constant 0 : i32
    return %c0_i32, %c0_i32_0 : i32, i32
  }
  func.func @transform_7(%arg0: i32) -> (i32, i32, i32) {
    %c0_i32 = arith.constant 0 : i32
    %c0_i32_0 = arith.constant 0 : i32
    %c0_i32_1 = arith.constant 0 : i32
    %c0_i32_2 = arith.constant 0 : i32
    return %c0_i32, %c0_i32_0, %c0_i32_1 : i32, i32, i32
  }
  func.func @transform_8(%arg0: i32) -> i32 {
    %c0_i32 = arith.constant 0 : i32
    %c0_i32_0 = arith.constant 0 : i32
    return %c0_i32 : i32
  }
  func.func @transform_9(%arg0: i32) -> (i32, i32, i32) {
    %c0_i32 = arith.constant 0 : i32
    %c0_i32_0 = arith.constant 0 : i32
    %c0_i32_1 = arith.constant 0 : i32
    return %arg0, %c0_i32, %c0_i32_0 : i32, i32, i32
  }
}

</mosaic_0001>

<bundles_post_ra>
// kernel: _forward_impl.1
= control target key start
LH: loop header
LB: loop body
LE: loop exit
PB: predicated region body
PF: predicated region fallthrough
CT: control target
= control target key end

     0   :  { %v3141_v1 = vmov 0   ;;  %vm309_vm0 = vcmask 130048   ;;  %vm1134_vm1 = vcmask 261120   ;;  %vm3143_vm2 = vmmov 0   ;;  %s3701_s1 = inlined_call_operand.vmem [shape: bf16[128,128], index: 1, kind: input, shape index: {}]   ;;  %s3702_s0 = inlined_call_operand.vmem [shape: bf16[128,128], index: 0, kind: input, shape index: {}]   ;;  %s3703_s4 = inlined_call_operand.vmem [shape: f32[256,1], index: 4, kind: input, shape index: {}]   ;;  %s3704_s3 = inlined_call_operand.vmem [shape: bf16[8,32,16], index: 3, kind: input, shape index: {}]   ;;  %s3705_s6 = inlined_call_operand.vmem [shape: f32[256,1], index: 6, kind: input, shape index: {}]   ;;  %s3706_s5 = inlined_call_operand.vmem [shape: bf16[8,32,32], index: 5, kind: input, shape index: {}]   ;;  %s3707_s7 = inlined_call_operand.vmem [shape: bf16[8,1,32], index: 7, kind: input, shape index: {}]   ;;  %s3708_s2 = inlined_call_operand.vmem [shape: bf16[128,64], index: 2, kind: input, shape index: {}]   ;;  %s3709_s8 = inlined_call_operand.<no memory space> [shape: f32[1], index: 8, kind: input, shape index: {}]   ;;  %s3710_s9 = inlined_call_operand.vmem [shape: f32[1,8,64], index: 9, kind: output, shape index: {}]  }
   0x1   :  { %v3079_v0 = vld [vmem:[%s3701_s1 + $0x38] sm:$0xff]   ;;  %3078 = vset.pattern.permute.xlu1 %v3141_v1  ;;  %3077 = vset.pattern.permute.xlu0 %v3141_v1  ;;  %v3080_v2 = vld [vmem:[%s3701_s1 + $0x30] sm:$0xff]   ;;  %v3081_v3 = vld [vmem:[%s3701_s1 + $0x28] sm:$0xff]   ;;  %vm2457_vm3 = vcmask 1041409   ;;  %vm2460_vm4 = vcmask 1042434   ;;  %vm2463_vm5 = vcmask 1043459  }
   0x2   :  { %2798 = vmatprep.subr.bf16.mxu0 %v3079_v0  ;;  %v3082_v4 = vld [vmem:[%s3701_s1 + $0x20] sm:$0xff]   ;;  %v3083_v6 = vld [vmem:[%s3701_s1 + $0x18] sm:$0xff]   ;;  %v3215_v7 = vld [vmem:[%s3701_s1 + $0x10] sm:$0xff]   ;;  %vm2466_vm6 = vcmask 1044484   ;;  %vm2469_vm7 = vcmask 1045509   ;;  %vm2472_vm8 = vcmask 1046534  }
   0x3   :  { %2799 = vmatpush3.bf16.msra.mxu0 %v3079_v0  ;;  %v3087_v5 = vld [vmem:[%s3702_s0] sm:$0xff]   ;;  %v822_v8 = vld [vmem:[%s3703_s4 + $0x10] sm:$0xff]  ;;  %v823_v10 = vld [vmem:[%s3703_s4 + $0x18] sm:$0xff]  ;;  %vm2475_vm9 = vcmask 1047559   ;;  %vm2567_vm10 = vcmask 523264  }
   0x4   :  { %2800 = vmatprep.subr.bf16.mxu0 %v3080_v2  ;;  %2814 = vmatprep.mubr.bf16.mxu0 %v3087_v5  ;;  %v820_v9 = vld [vmem:[%s3703_s4] sm:$0xff]  ;;  %v821_v11 = vld [vmem:[%s3703_s4 + $0x8] sm:$0xff]  ;;  %v826_v13 = vld [vmem:[%s3703_s4 + $0x30] sm:$0xff] }
   0x5   :  { %864 = vperm.xlu0 %3077, %v822_v8   ;;  %854 = vperm.xlu1 %3078, %v820_v9   ;;  %v3233_v12 = vld [vmem:[%s3701_s1 + $0x8] sm:$0xff]   ;;  %v827_v14 = vld [vmem:[%s3703_s4 + $0x38] sm:$0xff]  ;;  %v3246_v15 = vld [vmem:[%s3701_s1] sm:$0xff]  }
   0x6   :  { %v824_v16 = vld [vmem:[%s3703_s4 + $0x20] sm:$0xff]  ;;  %v825_v17 = vld [vmem:[%s3703_s4 + $0x28] sm:$0xff]  ;;  %v830_v19 = vld [vmem:[%s3703_s4 + $0x50] sm:$0xff] }
   0x7   :  { %2801 = vmatpush3.bf16.msra.mxu0 %v3080_v2  ;;  %v3088_v18 = vld [vmem:[%s3702_s0 + $0x8] sm:$0xff]   ;;  %v831_v20 = vld [vmem:[%s3703_s4 + $0x58] sm:$0xff]  ;;  %v3089_v21 = vld [vmem:[%s3702_s0 + $0x10] sm:$0xff]  }
   0x8   :  { %2802 = vmatprep.subr.bf16.mxu0 %v3081_v3  ;;  %v828_v22 = vld [vmem:[%s3703_s4 + $0x40] sm:$0xff]  ;;  %v829_v23 = vld [vmem:[%s3703_s4 + $0x48] sm:$0xff]  ;;  %v3090_v24 = vld [vmem:[%s3702_s0 + $0x18] sm:$0xff]  }
   0x9   :  { %869 = vperm.xlu0 %3077, %v823_v10   ;;  %859 = vperm.xlu1 %3078, %v821_v11   ;;  %v834_v25 = vld [vmem:[%s3703_s4 + $0x70] sm:$0xff]  ;;  %v835_v26 = vld [vmem:[%s3703_s4 + $0x78] sm:$0xff]  ;;  %v3091_v27 = vld [vmem:[%s3702_s0 + $0x20] sm:$0xff]  }
   0xa   :  { %v832_v28 = vld [vmem:[%s3703_s4 + $0x60] sm:$0xff]  ;;  %v833_v29 = vld [vmem:[%s3703_s4 + $0x68] sm:$0xff]  ;;  %v838_v31 = vld [vmem:[%s3703_s4 + $0x90] sm:$0xff] }
   0xb   :  { %2803 = vmatpush3.bf16.msra.mxu0 %v3081_v3  ;;  %v3092_v30 = vld [vmem:[%s3702_s0 + $0x28] sm:$0xff]   ;;  %v839_v32 = vld [vmem:[%s3703_s4 + $0x98] sm:$0xff]  ;;  %v3093_v33 = vld [vmem:[%s3702_s0 + $0x30] sm:$0xff]  }
   0xc   :  { %2804 = vmatprep.subr.bf16.mxu0 %v3082_v4  ;;  %v836_v34 = vld [vmem:[%s3703_s4 + $0x80] sm:$0xff]  ;;  %v837_v35 = vld [vmem:[%s3703_s4 + $0x88] sm:$0xff]  ;;  %v3094_v36 = vld [vmem:[%s3702_s0 + $0x38] sm:$0xff]  }
   0xd   :  { %884 = vperm.xlu0 %3077, %v826_v13   ;;  %889 = vperm.xlu1 %3078, %v827_v14   ;;  %v842_v37 = vld [vmem:[%s3703_s4 + $0xb0] sm:$0xff]  ;;  %v843_v38 = vld [vmem:[%s3703_s4 + $0xb8] sm:$0xff]  ;;  %v840_v39 = vld [vmem:[%s3703_s4 + $0xa0] sm:$0xff] }
   0xe   :  { %v841_v40 = vld [vmem:[%s3703_s4 + $0xa8] sm:$0xff]  ;;  %v846_v41 = vld [vmem:[%s3703_s4 + $0xd0] sm:$0xff]  ;;  %v847_v42 = vld [vmem:[%s3703_s4 + $0xd8] sm:$0xff] }
   0xf   :  { %2805 = vmatpush3.bf16.msra.mxu0 %v3082_v4  ;;  %v844_v43 = vld [vmem:[%s3703_s4 + $0xc0] sm:$0xff]  ;;  %v845_v45 = vld [vmem:[%s3703_s4 + $0xc8] sm:$0xff]  ;;  %v850_v46 = vld [vmem:[%s3703_s4 + $0xf0] sm:$0xff] }
  0x10   :  { %2806 = vmatprep.subr.bf16.mxu0 %v3083_v6  ;;  %v3095_v44 = vld [vmem:[%s3704_s3] sm:$0xff]   ;;  %v851_v47 = vld [vmem:[%s3703_s4 + $0xf8] sm:$0xff]  ;;  %v849_v49 = vld [vmem:[%s3703_s4 + $0xe8] sm:$0xff] }
  0x11   :  { %874 = vperm.xlu0 %3077, %v824_v16   ;;  %879 = vperm.xlu1 %3078, %v825_v17   ;;  %v848_v48 = vld [vmem:[%s3703_s4 + $0xe0] sm:$0xff]  ;;  %v1663_v50 = vld [vmem:[%s3705_s6 + $0x10] sm:$0xff]  ;;  %v1664_v51 = vld [vmem:[%s3705_s6 + $0x18] sm:$0xff] }
  0x12   :  { %2832 = vmatprep.mubr.msk.bf16.mxu1 %vm309_vm0, %v3095_v44  ;;  %v1661_v52 = vld [vmem:[%s3705_s6] sm:$0xff]  ;;  %v1662_v53 = vld [vmem:[%s3705_s6 + $0x8] sm:$0xff]  ;;  %v1667_v54 = vld [vmem:[%s3705_s6 + $0x30] sm:$0xff] }
  0x13   :  { %2807 = vmatpush3.bf16.msra.mxu0 %v3083_v6  ;;  %v1668_v55 = vld [vmem:[%s3705_s6 + $0x38] sm:$0xff]  ;;  %v1665_v56 = vld [vmem:[%s3705_s6 + $0x20] sm:$0xff]  ;;  %v1666_v57 = vld [vmem:[%s3705_s6 + $0x28] sm:$0xff] }
  0x14   :  { %2808 = vmatprep.subr.bf16.mxu0 %v3215_v7  ;;  %v1671_v58 = vld [vmem:[%s3705_s6 + $0x50] sm:$0xff]  ;;  %v1672_v59 = vld [vmem:[%s3705_s6 + $0x58] sm:$0xff]  ;;  %v1669_v60 = vld [vmem:[%s3705_s6 + $0x40] sm:$0xff] }
  0x15   :  { %904 = vperm.xlu0 %3077, %v830_v19   ;;  %909 = vperm.xlu1 %3078, %v831_v20   ;;  %v1670_v61 = vld [vmem:[%s3705_s6 + $0x48] sm:$0xff]  ;;  %v1675_v62 = vld [vmem:[%s3705_s6 + $0x70] sm:$0xff]  ;;  %v1676_v63 = vld [vmem:[%s3705_s6 + $0x78] sm:$0xff] }
  0x16   :  { %v1673_v0 = vld [vmem:[%s3705_s6 + $0x60] sm:$0xff]  ;;  %v1674_v1 = vld [vmem:[%s3705_s6 + $0x68] sm:$0xff]  ;;  %v1679_v2 = vld [vmem:[%s3705_s6 + $0x90] sm:$0xff] }
  0x17   :  { %2809 = vmatpush3.bf16.msra.mxu0 %v3215_v7  ;;  %v1680_v3 = vld [vmem:[%s3705_s6 + $0x98] sm:$0xff]  ;;  %v1677_v4 = vld [vmem:[%s3705_s6 + $0x80] sm:$0xff]  ;;  %v1678_v5 = vld [vmem:[%s3705_s6 + $0x88] sm:$0xff] }
  0x18   :  { %2810 = vmatprep.subr.bf16.mxu0 %v3233_v12  ;;  %v1683_v6 = vld [vmem:[%s3705_s6 + $0xb0] sm:$0xff]  ;;  %v1684_v8 = vld [vmem:[%s3705_s6 + $0xb8] sm:$0xff]  ;;  %v1681_v9 = vld [vmem:[%s3705_s6 + $0xa0] sm:$0xff] }
  0x19   :  { %894 = vperm.xlu0 %3077, %v828_v22   ;;  %899 = vperm.xlu1 %3078, %v829_v23   ;;  %v1682_v10 = vld [vmem:[%s3705_s6 + $0xa8] sm:$0xff]  ;;  %v1687_v11 = vld [vmem:[%s3705_s6 + $0xd0] sm:$0xff]  ;;  %v1688_v13 = vld [vmem:[%s3705_s6 + $0xd8] sm:$0xff] }
  0x1a   :  { %v1685_v14 = vld [vmem:[%s3705_s6 + $0xc0] sm:$0xff]  ;;  %v1686_v16 = vld [vmem:[%s3705_s6 + $0xc8] sm:$0xff]  ;;  %v1691_v17 = vld [vmem:[%s3705_s6 + $0xf0] sm:$0xff] }
  0x1b   :  { %2811 = vmatpush3.bf16.msra.mxu0 %v3233_v12  ;;  %v1689_v19 = vld [vmem:[%s3705_s6 + $0xe0] sm:$0xff]  ;;  %v1690_v20 = vld [vmem:[%s3705_s6 + $0xe8] sm:$0xff] }
  0x1c   :  { %2812 = vmatprep.subr.bf16.mxu0 %v3246_v15 }
  0x1d   :  { %924 = vperm.xlu0 %3077, %v834_v25   ;;  %929 = vperm.xlu1 %3078, %v835_v26  }
  0x1f   :  { %2813 = vmatpush3.bf16.msra.mxu0 %v3246_v15 }
  0x21   :  { %914 = vperm.xlu0 %3077, %v832_v28   ;;  %919 = vperm.xlu1 %3078, %v833_v29   ;;  %v3096_v28 = vld [vmem:[%s3704_s3 + $0x8] sm:$0xff]  }
  0x22   :  { %2815 = vmatmul.mubr.bf16.vlgmr.msra.gmra.mxu0 %v3088_v18  ;;  %v1692_v18 = vld [vmem:[%s3705_s6 + $0xf8] sm:$0xff] }
  0x23   :  { %2818 = vmatprep.mubr.bf16.mxu0 %v3089_v21 }
  0x25   :  { %944 = vperm.xlu0 %3077, %v838_v31   ;;  %949 = vperm.xlu1 %3078, %v839_v32  }
  0x29   :  { %934 = vperm.xlu0 %3077, %v836_v34   ;;  %939 = vperm.xlu1 %3078, %v837_v35   ;;  %v3098_v35 = vld [vmem:[%s3704_s3 + $0x18] sm:$0xff]  }
  0x2a   :  { %2819 = vmatmul.mubr.bf16.gmra.mxu0 %v3090_v24 }
  0x2b   :  { %2822 = vmatprep.mubr.bf16.mxu0 %v3091_v27 }
  0x2d   :  { %964 = vperm.xlu0 %3077, %v842_v37   ;;  %969 = vperm.xlu1 %3078, %v843_v38   ;;  %v3099_v37 = vld [vmem:[%s3704_s3 + $0x20] sm:$0xff]  }
  0x31   :  { %954 = vperm.xlu0 %3077, %v840_v39   ;;  %959 = vperm.xlu1 %3078, %v841_v40  }
  0x32   :  { %2823 = vmatmul.mubr.bf16.gmra.mxu0 %v3092_v30  ;;  %v3097_v30 = vld [vmem:[%s3704_s3 + $0x10] sm:$0xff]  }
  0x33   :  { %2826 = vmatprep.mubr.bf16.mxu0 %v3093_v33 }
  0x35   :  { %984 = vperm.xlu0 %3077, %v846_v41   ;;  %989 = vperm.xlu1 %3078, %v847_v42   ;;  %v3100_v41 = vld [vmem:[%s3704_s3 + $0x28] sm:$0xff]   ;;  %v3101_v42 = vld [vmem:[%s3704_s3 + $0x30] sm:$0xff]  }
  0x39   :  { %974 = vperm.xlu0 %3077, %v844_v43   ;;  %979 = vperm.xlu1 %3078, %v845_v45  }
  0x3a   :  { %2827 = vmatmul.mubr.bf16.gmra.mxu0 %v3094_v36 }
  0x3d   :  { %1004 = vperm.xlu0 %3077, %v850_v46   ;;  %1009 = vperm.xlu1 %3078, %v851_v47   ;;  %v3102_v46 = vld [vmem:[%s3704_s3 + $0x38] sm:$0xff]   ;;  %v3103_v47 = vld [vmem:[%s3704_s3 + $0x40] sm:$0xff]  }
  0x41   :  { %994 = vperm.xlu0 %3077, %v848_v48   ;;  %999 = vperm.xlu1 %3078, %v849_v49  }
  0x45   :  { %1705 = vperm.xlu0 %3077, %v1663_v50   ;;  %1710 = vperm.xlu1 %3078, %v1664_v51   ;;  %v3104_v51 = vld [vmem:[%s3704_s3 + $0x48] sm:$0xff]  }
  0x49   :  { %1695 = vperm.xlu0 %3077, %v1661_v52   ;;  %1700 = vperm.xlu1 %3078, %v1662_v53   ;;  %v3105_v52 = vld [vmem:[%s3704_s3 + $0x50] sm:$0xff]  }
  0x4d   :  { %1725 = vperm.xlu0 %3077, %v1667_v54   ;;  %1730 = vperm.xlu1 %3078, %v1668_v55   ;;  %v3106_v54 = vld [vmem:[%s3704_s3 + $0x58] sm:$0xff]   ;;  %v3107_v55 = vld [vmem:[%s3704_s3 + $0x60] sm:$0xff]  }
  0x51   :  { %1715 = vperm.xlu0 %3077, %v1665_v56   ;;  %1720 = vperm.xlu1 %3078, %v1666_v57   ;;  %v3108_v57 = vld [vmem:[%s3704_s3 + $0x68] sm:$0xff]  }
  0x55   :  { %1745 = vperm.xlu0 %3077, %v1671_v58   ;;  %1750 = vperm.xlu1 %3078, %v1672_v59   ;;  %v3109_v58 = vld [vmem:[%s3704_s3 + $0x70] sm:$0xff]   ;;  %v3110_v59 = vld [vmem:[%s3704_s3 + $0x78] sm:$0xff]  }
  0x59   :  { %1735 = vperm.xlu0 %3077, %v1669_v60   ;;  %1740 = vperm.xlu1 %3078, %v1670_v61   ;;  %v3111_v60 = vld [vmem:[%s3706_s5] sm:$0xff]  }
  0x5a   :  { %v3119_v61 = vld [vmem:[%s3706_s5 + $0x40] sm:$0xff]  }
  0x5b   :  { %2914 = vmatprep.mubr.msk.bf16.mxu0 %vm1134_vm1, %v3119_v61 }
  0x5d   :  { %1765 = vperm.xlu0 %3077, %v1675_v62   ;;  %1770 = vperm.xlu1 %3078, %v1676_v63  }
  0x61   :  { %1755 = vperm.xlu0 %3077, %v1673_v0   ;;  %1760 = vperm.xlu1 %3078, %v1674_v1  }
  0x65   :  { %1785 = vperm.xlu0 %3077, %v1679_v2   ;;  %1790 = vperm.xlu1 %3078, %v1680_v3  }
  0x69   :  { %1775 = vperm.xlu0 %3077, %v1677_v4   ;;  %1780 = vperm.xlu1 %3078, %v1678_v5  }
  0x6d   :  { %1805 = vperm.xlu0 %3077, %v1683_v6   ;;  %1810 = vperm.xlu1 %3078, %v1684_v8  }
  0x71   :  { %1795 = vperm.xlu0 %3077, %v1681_v9   ;;  %1800 = vperm.xlu1 %3078, %v1682_v10  }
  0x75   :  { %1825 = vperm.xlu0 %3077, %v1687_v11   ;;  %1830 = vperm.xlu1 %3078, %v1688_v13  }
  0x79   :  { %1815 = vperm.xlu0 %3077, %v1685_v14   ;;  %1820 = vperm.xlu1 %3078, %v1686_v16  }
  0x7d   :  { %1845 = vperm.xlu0 %3077, %v1691_v17   ;;  %1850 = vperm.xlu1 %3078, %v1692_v18  }
  0x80   :  { %v865_v62 = vpop.permute.xlu0 %864  ;;  %v855_v63 = vpop.permute.xlu1 %854 }
  0x81   :  { %1835 = vperm.xlu0 %3077, %v1689_v19   ;;  %1840 = vperm.xlu1 %3078, %v1690_v20  }
  0x84   :  { %v870_v0 = vpop.permute.xlu0 %869  ;;  %v860_v1 = vpop.permute.xlu1 %859 }
  0x88   :  { %v885_v2 = vpop.permute.xlu0 %884  ;;  %v890_v3 = vpop.permute.xlu1 %889 }
  0x8c   :  { %v875_v4 = vpop.permute.xlu0 %874  ;;  %v880_v5 = vpop.permute.xlu1 %879 }
  0x90   :  { %v905_v6 = vpop.permute.xlu0 %904  ;;  %v910_v8 = vpop.permute.xlu1 %909 }
  0x94   :  { %v895_v9 = vpop.permute.xlu0 %894  ;;  %v900_v11 = vpop.permute.xlu1 %899 }
  0x98   :  { %v925_v19 = vpop.permute.xlu0 %924 }
  0xe2   :  { %v2816_v21 = vpop.f32.mrf.mxu0 }
  0xe4   :  { %v196_v22 = vpop.f32.mrf.mxu0 }
  0xe6   :  { %v2817_v23 = vpop.f32.mrf.mxu0 }
  0xe7   :  { %v292_v27 = vpack.c.bf16 %v2817_v23, %v2816_v21 }
  0xe8   :  { %v199_v24 = vpop.f32.mrf.mxu0 }
  0xe9   :  { %v291_v25 = vpack.c.bf16 %v199_v24, %v196_v22  ;;  %v930_v24 = vpop.permute.xlu1 %929 }
  0xea   :  { %v2820_v26 = vpop.f32.mrf.mxu0 }
  0xeb   :  { %2830 = vmatprep.subr.bf16.mxu1 %v291_v25 }
  0xec   :  { %2831 = vmatpush3.bf16.msra.mxu1 %v291_v25  ;;  %v212_v29 = vpop.f32.mrf.mxu0 }
  0xed   :  { %2836 = vmatprep.subr.bf16.mxu1 %v292_v27 }
  0xee   :  { %v2821_v31 = vpop.f32.mrf.mxu0 }
  0xef   :  { %2833 = vmatmul.mubr.msk.bf16.vlgmr.msra.gmra.mxu1 %vm309_vm0, %v3096_v28  ;;  %v294_v39 = vpack.c.bf16 %v2821_v31, %v2820_v26 }
  0xf0   :  { %2837 = vmatpush3.bf16.msra.mxu1 %v292_v27  ;;  %v215_v32 = vpop.f32.mrf.mxu0  ;;  %2838 = vmatprep.mubr.msk.bf16.mxu1 %vm309_vm0, %v3097_v30 }
  0xf1   :  { %v293_v33 = vpack.c.bf16 %v215_v32, %v212_v29  ;;  %v915_v32 = vpop.permute.xlu0 %914 }
  0xf2   :  { %v2824_v34 = vpop.f32.mrf.mxu0 }
  0xf3   :  { %2842 = vmatprep.subr.bf16.mxu1 %v293_v33 }
  0xf4   :  { %v228_v36 = vpop.f32.mrf.mxu0 }
  0xf6   :  { %v2825_v38 = vpop.f32.mrf.mxu0 }
  0xf7   :  { %2839 = vmatmul.mubr.msk.bf16.vlgmr.msra.gmra.mxu1 %vm309_vm0, %v3098_v35  ;;  %v296_v49 = vpack.c.bf16 %v2825_v38, %v2824_v34 }
  0xf8   :  { %2843 = vmatpush3.bf16.msra.mxu1 %v293_v33  ;;  %2844 = vmatprep.mubr.msk.bf16.mxu1 %vm309_vm0, %v3099_v37  ;;  %v231_v40 = vpop.f32.mrf.mxu0 }
  0xf9   :  { %2848 = vmatprep.subr.bf16.mxu1 %v294_v39  ;;  %v295_v43 = vpack.c.bf16 %v231_v40, %v228_v36  ;;  %v920_v36 = vpop.permute.xlu1 %919 }
  0xfa   :  { %v2828_v44 = vpop.f32.mrf.mxu0 }
  0xfc   :  { %v244_v45 = vpop.f32.mrf.mxu0 }
  0xfe   :  { %v2829_v48 = vpop.f32.mrf.mxu0 }
  0xff   :  { %2845 = vmatmul.mubr.msk.bf16.vlgmr.msra.gmra.mxu1 %vm309_vm0, %v3100_v41  ;;  %v298_v56 = vpack.c.bf16 %v2829_v48, %v2828_v44  ;;  %v3112_v41 = vld [vmem:[%s3706_s5 + $0x8] sm:$0xff]  }
 0x100   :  { %2849 = vmatpush3.bf16.msra.mxu1 %v294_v39  ;;  %2850 = vmatprep.mubr.msk.bf16.mxu1 %vm309_vm0, %v3101_v42  ;;  %v247_v50 = vpop.f32.mrf.mxu0 }
 0x101   :  { %2854 = vmatprep.subr.bf16.mxu1 %v295_v43  ;;  %v297_v53 = vpack.c.bf16 %v247_v50, %v244_v45 }
 0x107   :  { %2851 = vmatmul.mubr.msk.bf16.vlgmr.msra.gmra.mxu1 %vm309_vm0, %v3102_v46 }
 0x108   :  { %2855 = vmatpush3.bf16.msra.mxu1 %v295_v43  ;;  %2856 = vmatprep.mubr.msk.bf16.mxu1 %vm309_vm0, %v3103_v47  ;;  %v3113_v43 = vld [vmem:[%s3706_s5 + $0x10] sm:$0xff]   ;;  %v945_v47 = vpop.permute.xlu0 %944 }
 0x109   :  { %2860 = vmatprep.subr.bf16.mxu1 %v296_v49 }
 0x10f   :  { %2857 = vmatmul.mubr.msk.bf16.vlgmr.msra.gmra.mxu1 %vm309_vm0, %v3104_v51  ;;  %v950_v51 = vpop.permute.xlu1 %949 }
 0x110   :  { %2861 = vmatpush3.bf16.msra.mxu1 %v296_v49  ;;  %2862 = vmatprep.mubr.msk.bf16.mxu1 %vm309_vm0, %v3105_v52 }
 0x111   :  { %2866 = vmatprep.subr.bf16.mxu1 %v297_v53 }
 0x117   :  { %2863 = vmatmul.mubr.msk.bf16.vlgmr.msra.gmra.mxu1 %vm309_vm0, %v3106_v54 }
 0x118   :  { %2867 = vmatpush3.bf16.msra.mxu1 %v297_v53  ;;  %2868 = vmatprep.mubr.msk.bf16.mxu1 %vm309_vm0, %v3107_v55 }
 0x119   :  { %2872 = vmatprep.subr.bf16.mxu1 %v298_v56 }
 0x11f   :  { %2869 = vmatmul.mubr.msk.bf16.vlgmr.msra.gmra.mxu1 %vm309_vm0, %v3108_v57 }
 0x120   :  { %2873 = vmatpush3.bf16.msra.mxu1 %v298_v56  ;;  %2874 = vmatprep.mubr.msk.bf16.mxu1 %vm309_vm0, %v3109_v58 }
 0x127   :  { %2875 = vmatmul.mubr.msk.bf16.vlgmr.msra.gmra.mxu1 %vm309_vm0, %v3110_v59  ;;  %v3114_v59 = vld [vmem:[%s3706_s5 + $0x18] sm:$0xff]  }
 0x128   :  { %2882 = vmatprep.mubr.msk.bf16.mxu1 %vm1134_vm1, %v3111_v60  ;;  %v935_v60 = vpop.permute.xlu0 %934 }
 0x1af   :  { %v2834_v10 = vpop.f32.mrf.mxu1 }
 0x1b0   :  { %v1014_v14 = vadd.f32 %v2834_v10, %v865_v62  ;;  %v3115_v62 = vld [vmem:[%s3706_s5 + $0x20] sm:$0xff]   ;;  %v965_v10 = vpop.permute.xlu0 %964 }
 0x1b1   :  { %v350_v13 = vpop.f32.mrf.mxu1 }
 0x1b2   :  { %v1012_v17 = vadd.f32 %v855_v63, %v350_v13  ;;  %v1046_v21 = vmax.f32 %v1014_v14, 0.0 }
 0x1b3   :  { %v2835_v16 = vpop.f32.mrf.mxu1 }
 0x1b4   :  { %v1015_v18 = vadd.f32 %v2835_v16, %v870_v0  ;;  %v1044_v26 = vmax.f32 %v1012_v17, 0.0  ;;  %v3116_v17 = vld [vmem:[%s3706_s5 + $0x28] sm:$0xff]  }
 0x1b5   :  { %v353_v20 = vpop.f32.mrf.mxu1 }
 0x1b6   :  { %v1047_v22 = vmax.f32 %v1015_v18, 0.0  ;;  %v1013_v23 = vadd.f32 %v860_v1, %v353_v20  ;;  %v3117_v20 = vld [vmem:[%s3706_s5 + $0x30] sm:$0xff]  }
 0x1b7   :  { %v2840_v25 = vpop.f32.mrf.mxu1 }
 0x1b8   :  { %v1077_v27 = vpack.c.bf16 %v1047_v22, %v1046_v21  ;;  %v1045_v28 = vmax.f32 %v1013_v23, 0.0  ;;  %v1018_v31 = vadd.f32 %v2840_v25, %v885_v2  ;;  %v940_v2 = vpop.permute.xlu1 %939 }
 0x1b9   :  { %v415_v29 = vpop.f32.mrf.mxu1 }
 0x1ba   :  { %v1076_v30 = vpack.c.bf16 %v1045_v28, %v1044_v26  ;;  %2878 = vmatprep.subr.bf16.mxu1 %v1077_v27  ;;  %v1016_v34 = vadd.f32 %v875_v4, %v415_v29  ;;  %v1050_v38 = vmax.f32 %v1018_v31, 0.0 }
 0x1bb   :  { %v2841_v33 = vpop.f32.mrf.mxu1  ;;  %2879 = vmatpush3.bf16.msra.mxu1 %v1077_v27  ;;  %v955_v27 = vpop.permute.xlu0 %954 }
 0x1bc   :  { %v1019_v35 = vadd.f32 %v2841_v33, %v890_v3  ;;  %2880 = vmatprep.subr.bf16.mxu1 %v1076_v30  ;;  %v1048_v44 = vmax.f32 %v1016_v34, 0.0  ;;  %v970_v18 = vpop.permute.xlu1 %969 }
 0x1bd   :  { %v418_v37 = vpop.f32.mrf.mxu1 }
 0x1be   :  { %v1051_v39 = vmax.f32 %v1019_v35, 0.0  ;;  %v1017_v40 = vadd.f32 %v880_v5, %v418_v37 }
 0x1bf   :  { %v2846_v42 = vpop.f32.mrf.mxu1  ;;  %2881 = vmatpush3.bf16.msra.mxu1 %v1076_v30 }
 0x1c0   :  { %v1079_v45 = vpack.c.bf16 %v1051_v39, %v1050_v38  ;;  %v1049_v46 = vmax.f32 %v1017_v40, 0.0  ;;  %v1022_v50 = vadd.f32 %v2846_v42, %v905_v6  ;;  %v960_v31 = vpop.permute.xlu1 %959  ;;  %v3121_v38 = vld [vmem:[%s3706_s5 + $0x50] sm:$0xff]   ;;  %v985_v42 = vpop.permute.xlu0 %984 }
 0x1c1   :  { %v480_v48 = vpop.f32.mrf.mxu1 }
 0x1c2   :  { %v1078_v49 = vpack.c.bf16 %v1049_v46, %v1048_v44  ;;  %2883 = vmatmul.mubr.msk.bf16.vlgmr.msra.gmra.mxu1 %vm1134_vm1, %v3112_v41  ;;  %2886 = vmatprep.subr.bf16.mxu1 %v1079_v45  ;;  %v1020_v53 = vadd.f32 %v895_v9, %v480_v48  ;;  %v1054_v56 = vmax.f32 %v1022_v50, 0.0 }
 0x1c3   :  { %v2847_v52 = vpop.f32.mrf.mxu1  ;;  %2887 = vmatpush3.bf16.msra.mxu1 %v1079_v45  ;;  %2890 = vmatprep.mubr.msk.bf16.mxu1 %vm1134_vm1, %v3113_v43 }
 0x1c4   :  { %v1023_v54 = vadd.f32 %v2847_v52, %v910_v8  ;;  %2888 = vmatprep.subr.bf16.mxu1 %v1078_v49  ;;  %v1052_v63 = vmax.f32 %v1020_v53, 0.0  ;;  %v990_v46 = vpop.permute.xlu1 %989 }
 0x1c5   :  { %v483_v55 = vpop.f32.mrf.mxu1 }
 0x1c6   :  { %v1055_v57 = vmax.f32 %v1023_v54, 0.0  ;;  %v1021_v58 = vadd.f32 %v900_v11, %v483_v55  ;;  %v3120_v54 = vld [vmem:[%s3706_s5 + $0x48] sm:$0xff]   ;;  %v975_v55 = vpop.permute.xlu0 %974 }
 0x1c7   :  { %v2852_v61 = vpop.f32.mrf.mxu1  ;;  %2889 = vmatpush3.bf16.msra.mxu1 %v1078_v49 }
 0x1c8   :  { %v1081_v0 = vpack.c.bf16 %v1055_v57, %v1054_v56  ;;  %v1053_v1 = vmax.f32 %v1021_v58, 0.0  ;;  %v1026_v5 = vadd.f32 %v2852_v61, %v925_v19  ;;  %v3123_v57 = vld [vmem:[%s3706_s5 + $0x60] sm:$0xff]   ;;  %v980_v61 = vpop.permute.xlu1 %979 }
 0x1c9   :  { %v545_v3 = vpop.f32.mrf.mxu1 }
 0x1ca   :  { %v1080_v4 = vpack.c.bf16 %v1053_v1, %v1052_v63  ;;  %2891 = vmatmul.mubr.msk.bf16.vlgmr.msra.gmra.mxu1 %vm1134_vm1, %v3114_v59  ;;  %2894 = vmatprep.subr.bf16.mxu1 %v1081_v0  ;;  %v1024_v8 = vadd.f32 %v915_v32, %v545_v3  ;;  %v1058_v13 = vmax.f32 %v1026_v5, 0.0 }
 0x1cb   :  { %v2853_v6 = vpop.f32.mrf.mxu1  ;;  %2895 = vmatpush3.bf16.msra.mxu1 %v1081_v0  ;;  %2898 = vmatprep.mubr.msk.bf16.mxu1 %vm1134_vm1, %v3115_v62 }
 0x1cc   :  { %v1027_v9 = vadd.f32 %v2853_v6, %v930_v24  ;;  %2896 = vmatprep.subr.bf16.mxu1 %v1080_v4  ;;  %v1056_v21 = vmax.f32 %v1024_v8, 0.0 }
 0x1cd   :  { %v548_v11 = vpop.f32.mrf.mxu1 }
 0x1ce   :  { %v1059_v14 = vmax.f32 %v1027_v9, 0.0  ;;  %v1025_v16 = vadd.f32 %v920_v36, %v548_v11  ;;  %v3118_v36 = vld [vmem:[%s3706_s5 + $0x38] sm:$0xff]   ;;  %v1010_v11 = vpop.permute.xlu1 %1009 }
 0x1cf   :  { %v2858_v19 = vpop.f32.mrf.mxu1  ;;  %2897 = vmatpush3.bf16.msra.mxu1 %v1080_v4  ;;  %v1005_v4 = vpop.permute.xlu0 %1004 }
 0x1d0   :  { %v1083_v22 = vpack.c.bf16 %v1059_v14, %v1058_v13  ;;  %v1057_v23 = vmax.f32 %v1025_v16, 0.0  ;;  %v1030_v26 = vadd.f32 %v2858_v19, %v945_v47  ;;  %v3125_v14 = vld [vmem:[%s3706_s5 + $0x70] sm:$0xff]  }
 0x1d1   :  { %v610_v24 = vpop.f32.mrf.mxu1 }
 0x1d2   :  { %v1082_v25 = vpack.c.bf16 %v1057_v23, %v1056_v21  ;;  %2899 = vmatmul.mubr.msk.bf16.vlgmr.msra.gmra.mxu1 %vm1134_vm1, %v3116_v17  ;;  %2902 = vmatprep.subr.bf16.mxu1 %v1083_v22  ;;  %v1028_v29 = vadd.f32 %v935_v60, %v610_v24  ;;  %v1062_v33 = vmax.f32 %v1030_v26, 0.0  ;;  %v1000_v26 = vpop.permute.xlu1 %999 }
 0x1d3   :  { %v2859_v28 = vpop.f32.mrf.mxu1  ;;  %2903 = vmatpush3.bf16.msra.mxu1 %v1083_v22  ;;  %2906 = vmatprep.mubr.msk.bf16.mxu1 %vm1134_vm1, %v3117_v20  ;;  %v995_v22 = vpop.permute.xlu0 %994 }
 0x1d4   :  { %v1031_v30 = vadd.f32 %v2859_v28, %v950_v51  ;;  %2904 = vmatprep.subr.bf16.mxu1 %v1082_v25  ;;  %v1060_v39 = vmax.f32 %v1028_v29, 0.0 }
 0x1d5   :  { %v613_v32 = vpop.f32.mrf.mxu1 }
 0x1d6   :  { %v1063_v34 = vmax.f32 %v1031_v30, 0.0  ;;  %v1029_v35 = vadd.f32 %v940_v2, %v613_v32 }
 0x1d7   :  { %v2864_v37 = vpop.f32.mrf.mxu1  ;;  %2905 = vmatpush3.bf16.msra.mxu1 %v1082_v25 }
 0x1d8   :  { %v1085_v40 = vpack.c.bf16 %v1063_v34, %v1062_v33  ;;  %v1061_v41 = vmax.f32 %v1029_v35, 0.0  ;;  %v1034_v45 = vadd.f32 %v2864_v37, %v965_v10  ;;  %v3122_v10 = vld [vmem:[%s3706_s5 + $0x58] sm:$0xff]   ;;  %v3136_v37 = vld [vmem:[%s3701_s1 + $0x30] sm:$0xff]  }
 0x1d9   :  { %v675_v43 = vpop.f32.mrf.mxu1  ;;  %v3135_v35 = vld [vmem:[%s3701_s1 + $0x38] sm:$0xff]  }
 0x1da   :  { %v1084_v44 = vpack.c.bf16 %v1061_v41, %v1060_v39  ;;  %2907 = vmatmul.mubr.msk.bf16.vlgmr.msra.gmra.mxu1 %vm1134_vm1, %v3118_v36  ;;  %2910 = vmatprep.subr.bf16.mxu0 %v1085_v40  ;;  %v1032_v48 = vadd.f32 %v955_v27, %v675_v43  ;;  %v1066_v51 = vmax.f32 %v1034_v45, 0.0  ;;  %v3137_v39 = vld [vmem:[%s3701_s1 + $0x28] sm:$0xff]   ;;  %v3139_v41 = vld [vmem:[%s3701_s1 + $0x18] sm:$0xff]  }
 0x1db   :  { %v2865_v47 = vpop.f32.mrf.mxu1  ;;  %2911 = vmatpush3.bf16.msra.mxu0 %v1085_v40  ;;  %2922 = vmatprep.mubr.msk.bf16.mxu1 %vm1134_vm1, %v3121_v38  ;;  %v3126_v38 = vld [vmem:[%s3706_s5 + $0x78] sm:$0xff]   ;;  %v3138_v40 = vld [vmem:[%s3701_s1 + $0x20] sm:$0xff]  }
 0x1dc   :  { %v1035_v49 = vadd.f32 %v2865_v47, %v970_v18  ;;  %2912 = vmatprep.subr.bf16.mxu0 %v1084_v44  ;;  %v1064_v58 = vmax.f32 %v1032_v48, 0.0 }
 0x1dd   :  { %v678_v50 = vpop.f32.mrf.mxu1 }
 0x1de   :  { %v1067_v52 = vmax.f32 %v1035_v49, 0.0  ;;  %v1033_v53 = vadd.f32 %v960_v31, %v678_v50  ;;  %v3124_v31 = vld [vmem:[%s3706_s5 + $0x68] sm:$0xff]  }
 0x1df   :  { %v2870_v56 = vpop.f32.mrf.mxu1  ;;  %2913 = vmatpush3.bf16.msra.mxu0 %v1084_v44 }
 0x1e0   :  { %v1087_v59 = vpack.c.bf16 %v1067_v52, %v1066_v51  ;;  %v1065_v60 = vmax.f32 %v1033_v53, 0.0  ;;  %v1038_v0 = vadd.f32 %v2870_v56, %v985_v42  ;;  %v3140_v42 = vld [vmem:[%s3701_s1 + $0x10] sm:$0xff]  }
 0x1e1   :  { %v740_v62 = vpop.f32.mrf.mxu1 }
 0x1e2   :  { %v1086_v63 = vpack.c.bf16 %v1065_v60, %v1064_v58  ;;  %2915 = vmatmul.mubr.msk.bf16.vlgmr.msra.gmra.mxu0 %vm1134_vm1, %v3120_v54  ;;  %2918 = vmatprep.subr.bf16.mxu1 %v1087_v59  ;;  %v1036_v2 = vadd.f32 %v975_v55, %v740_v62  ;;  %v1070_v6 = vmax.f32 %v1038_v0, 0.0 }
 0x1e3   :  { %v2871_v1 = vpop.f32.mrf.mxu1  ;;  %2919 = vmatpush3.bf16.msra.mxu1 %v1087_v59  ;;  %2930 = vmatprep.mubr.msk.bf16.mxu0 %vm1134_vm1, %v3123_v57 }
 0x1e4   :  { %v1039_v3 = vadd.f32 %v2871_v1, %v990_v46  ;;  %2920 = vmatprep.subr.bf16.mxu1 %v1086_v63  ;;  %v1068_v16 = vmax.f32 %v1036_v2, 0.0 }
 0x1e5   :  { %v743_v5 = vpop.f32.mrf.mxu1 }
 0x1e6   :  { %v1071_v8 = vmax.f32 %v1039_v3, 0.0  ;;  %v1037_v9 = vadd.f32 %v980_v61, %v743_v5 }
 0x1e7   :  { %v2876_v13 = vpop.f32.mrf.mxu1  ;;  %2921 = vmatpush3.bf16.msra.mxu1 %v1086_v63 }
 0x1e8   :  { %v1089_v17 = vpack.c.bf16 %v1071_v8, %v1070_v6  ;;  %v1069_v18 = vmax.f32 %v1037_v9, 0.0  ;;  %v1042_v21 = vadd.f32 %v2876_v13, %v1005_v4 }
 0x1e9   :  { %v805_v19 = vpop.f32.mrf.mxu1 }
 0x1ea   :  { %v1088_v20 = vpack.c.bf16 %v1069_v18, %v1068_v16  ;;  %2923 = vmatmul.mubr.msk.bf16.vlgmr.msra.gmra.mxu1 %vm1134_vm1, %v3122_v10  ;;  %2926 = vmatprep.subr.bf16.mxu0 %v1089_v17  ;;  %v1040_v24 = vadd.f32 %v995_v22, %v805_v19  ;;  %v1074_v28 = vmax.f32 %v1042_v21, 0.0 }
 0x1eb   :  { %v2877_v23 = vpop.f32.mrf.mxu1  ;;  %2927 = vmatpush3.bf16.msra.mxu0 %v1089_v17  ;;  %2938 = vmatprep.mubr.msk.bf16.mxu1 %vm1134_vm1, %v3125_v14 }
 0x1ec   :  { %v1043_v25 = vadd.f32 %v2877_v23, %v1010_v11  ;;  %2928 = vmatprep.subr.bf16.mxu0 %v1088_v20  ;;  %v1072_v32 = vmax.f32 %v1040_v24, 0.0 }
 0x1ed   :  { %v808_v27 = vpop.f32.mrf.mxu1 }
 0x1ee   :  { %v1075_v29 = vmax.f32 %v1043_v25, 0.0  ;;  %v1041_v30 = vadd.f32 %v1000_v26, %v808_v27  ;;  %v3142_v27 = vmov 0.0  }
 0x1ef   :  { %2929 = vmatpush3.bf16.msra.mxu0 %v1088_v20 }
 0x1f0   :  { %v1091_v33 = vpack.c.bf16 %v1075_v29, %v1074_v28  ;;  %v1073_v34 = vmax.f32 %v1041_v30, 0.0  ;;  %2942 = vmatprep.subr.bf16.mxu0 %v3135_v35  ;;  %v1706_v28 = vpop.permute.xlu0 %1705  ;;  %v1711_v29 = vpop.permute.xlu1 %1710 }
 0x1f2   :  { %v1090_v36 = vpack.c.bf16 %v1073_v34, %v1072_v32  ;;  %2931 = vmatmul.mubr.msk.bf16.vlgmr.msra.gmra.mxu0 %vm1134_vm1, %v3124_v31  ;;  %2934 = vmatprep.subr.bf16.mxu1 %v1091_v33 }
 0x1f3   :  { %2935 = vmatpush3.bf16.msra.mxu1 %v1091_v33  ;;  %2943 = vmatpush3.bf16.msra.mxu0 %v3135_v35 }
 0x1f4   :  { %2936 = vmatprep.subr.bf16.mxu1 %v1090_v36  ;;  %2944 = vmatprep.subr.bf16.mxu0 %v3136_v37  ;;  %v1696_v30 = vpop.permute.xlu0 %1695  ;;  %v1701_v31 = vpop.permute.xlu1 %1700 }
 0x1f7   :  { %2937 = vmatpush3.bf16.msra.mxu1 %v1090_v36  ;;  %2945 = vmatpush3.bf16.msra.mxu0 %v3136_v37 }
 0x1f8   :  { %2946 = vmatprep.subr.bf16.mxu0 %v3137_v39  ;;  %2990 = vmatprep.subr.bf16.mxu1 %v3142_v27  ;;  %v1726_v32 = vpop.permute.xlu0 %1725  ;;  %v1731_v33 = vpop.permute.xlu1 %1730 }
 0x1fa   :  { %2939 = vmatmul.mubr.msk.bf16.vlgmr.msra.gmra.mxu1 %vm1134_vm1, %v3126_v38 }
 0x1fb   :  { %2947 = vmatpush3.bf16.msra.mxu0 %v3137_v39  ;;  %2994 = vmatprep.mubr.msk.bf16.mxu1 %vm3143_vm2, %v3142_v27 }
 0x1fc   :  { %2948 = vmatprep.subr.bf16.mxu0 %v3138_v40  ;;  %v1716_v34 = vpop.permute.xlu0 %1715  ;;  %v1721_v35 = vpop.permute.xlu1 %1720 }
 0x1ff   :  { %2949 = vmatpush3.bf16.msra.mxu0 %v3138_v40 }
 0x200   :  { %2950 = vmatprep.subr.bf16.mxu0 %v3139_v41  ;;  %v1746_v36 = vpop.permute.xlu0 %1745  ;;  %v1751_v37 = vpop.permute.xlu1 %1750 }
 0x203   :  { %2951 = vmatpush3.bf16.msra.mxu0 %v3139_v41 }
 0x204   :  { %2952 = vmatprep.subr.bf16.mxu0 %v3215_v7  ;;  %v1736_v39 = vpop.permute.xlu0 %1735  ;;  %v1741_v40 = vpop.permute.xlu1 %1740 }
 0x207   :  { %2953 = vmatpush3.bf16.msra.mxu0 %v3140_v42 }
 0x208   :  { %2954 = vmatprep.subr.bf16.mxu0 %v3233_v12 }
 0x20b   :  { %2955 = vmatpush3.bf16.msra.mxu0 %v3233_v12 }
 0x20c   :  { %2956 = vmatprep.subr.bf16.mxu0 %v3246_v15 }
 0x20f   :  { %2957 = vmatpush3.bf16.msra.mxu0 %v3246_v15 }
 0x210   :  { %3054 = vmatprep.subr.bf16.mxu0 %v3142_v27 }
 0x282   :  { %v2884_v43 = vpop.f32.mrf.mxu1 }
 0x284   :  { %v1175_v44 = vpop.f32.mrf.mxu1 }
 0x286   :  { %v2885_v45 = vpop.f32.mrf.mxu1 }
 0x287   :  { %v1646_v48 = vpack.c.bf16 %v2885_v45, %v2884_v43 }
 0x288   :  { %v1178_v46 = vpop.f32.mrf.mxu1 }
 0x289   :  { %v1645_v47 = vpack.c.bf16 %v1178_v46, %v1175_v44  ;;  %v1766_v46 = vpop.permute.xlu0 %1765 }
 0x28a   :  { %v2892_v7 = vpop.f32.mrf.mxu1 }
 0x28b   :  { %2958 = vmatprep.mubr.bf16.mxu0 %v1645_v47 }
 0x28c   :  { %v1240_v49 = vpop.f32.mrf.mxu1  ;;  %2959 = vmatmul.mubr.bf16.vlgmr.msra.gmra.mxu0 %v1646_v48 }
 0x28e   :  { %v2893_v50 = vpop.f32.mrf.mxu1 }
 0x28f   :  { %v1648_v53 = vpack.c.bf16 %v2893_v50, %v2892_v7  ;;  %v1771_v50 = vpop.permute.xlu1 %1770 }
 0x290   :  { %v1243_v51 = vpop.f32.mrf.mxu1 }
 0x291   :  { %v1647_v52 = vpack.c.bf16 %v1243_v51, %v1240_v49 }
 0x292   :  { %v2900_v54 = vpop.f32.mrf.mxu1 }
 0x293   :  { %2962 = vmatprep.mubr.bf16.mxu0 %v1647_v52 }
 0x294   :  { %v1305_v12 = vpop.f32.mrf.mxu1  ;;  %2963 = vmatmul.mubr.bf16.gmra.mxu0 %v1648_v53 }
 0x296   :  { %v2901_v55 = vpop.f32.mrf.mxu1 }
 0x297   :  { %v1650_v57 = vpack.c.bf16 %v2901_v55, %v2900_v54 }
 0x298   :  { %v1308_v15 = vpop.f32.mrf.mxu1 }
 0x299   :  { %v1649_v56 = vpack.c.bf16 %v1308_v15, %v1305_v12 }
 0x29a   :  { %v2908_v58 = vpop.f32.mrf.mxu1 }
 0x29b   :  { %2966 = vmatprep.mubr.bf16.mxu0 %v1649_v56  ;;  %v1756_v56 = vpop.permute.xlu0 %1755 }
 0x29c   :  { %v1370_v59 = vpop.f32.mrf.mxu1  ;;  %2967 = vmatmul.mubr.bf16.gmra.mxu0 %v1650_v57 }
 0x29e   :  { %v2909_v60 = vpop.f32.mrf.mxu1 }
 0x29f   :  { %v1652_v63 = vpack.c.bf16 %v2909_v60, %v2908_v58 }
 0x2a0   :  { %v1373_v61 = vpop.f32.mrf.mxu1 }
 0x2a1   :  { %v1651_v62 = vpack.c.bf16 %v1373_v61, %v1370_v59  ;;  %v1761_v59 = vpop.permute.xlu1 %1760 }
 0x2a2   :  { %v2916_v0 = vpop.f32.mrf.mxu0 }
 0x2a3   :  { %2970 = vmatprep.mubr.bf16.mxu0 %v1651_v62 }
 0x2a4   :  { %v1435_v1 = vpop.f32.mrf.mxu0  ;;  %2971 = vmatmul.mubr.bf16.gmra.mxu0 %v1652_v63 }
 0x2a6   :  { %v2917_v2 = vpop.f32.mrf.mxu0 }
 0x2a7   :  { %v1654_v5 = vpack.c.bf16 %v2917_v2, %v2916_v0 }
 0x2a8   :  { %v1438_v3 = vpop.f32.mrf.mxu0 }
 0x2a9   :  { %v1653_v4 = vpack.c.bf16 %v1438_v3, %v1435_v1  ;;  %v2062_v1 = vld [vmem:[%s3707_s7] sm:$0x1] }
 0x2aa   :  { %v2924_v6 = vpop.f32.mrf.mxu1 }
 0x2ab   :  { %2974 = vmatprep.mubr.bf16.mxu0 %v1653_v4 }
 0x2ac   :  { %v1500_v8 = vpop.f32.mrf.mxu1  ;;  %2975 = vmatmul.mubr.bf16.gmra.mxu0 %v1654_v5 }
 0x2ae   :  { %v2925_v9 = vpop.f32.mrf.mxu1 }
 0x2af   :  { %v1656_v13 = vpack.c.bf16 %v2925_v9, %v2924_v6  ;;  %v1786_v6 = vpop.permute.xlu0 %1785 }
 0x2b0   :  { %v1503_v10 = vpop.f32.mrf.mxu1 }
 0x2b1   :  { %v1655_v11 = vpack.c.bf16 %v1503_v10, %v1500_v8  ;;  %v1791_v10 = vpop.permute.xlu1 %1790 }
 0x2b2   :  { %v2932_v14 = vpop.f32.mrf.mxu0 }
 0x2b3   :  { %2978 = vmatprep.mubr.bf16.mxu0 %v1655_v11 }
 0x2b4   :  { %v1565_v16 = vpop.f32.mrf.mxu0  ;;  %2979 = vmatmul.mubr.bf16.gmra.mxu0 %v1656_v13 }
 0x2b6   :  { %v2933_v17 = vpop.f32.mrf.mxu0 }
 0x2b7   :  { %v1658_v20 = vpack.c.bf16 %v2933_v17, %v2932_v14 }
 0x2b8   :  { %v1568_v18 = vpop.f32.mrf.mxu0 }
 0x2b9   :  { %v1657_v19 = vpack.c.bf16 %v1568_v18, %v1565_v16 }
 0x2ba   :  { %v2940_v21 = vpop.f32.mrf.mxu1 }
 0x2bb   :  { %2982 = vmatprep.mubr.bf16.mxu0 %v1657_v19 }
 0x2bc   :  { %v1630_v22 = vpop.f32.mrf.mxu1  ;;  %2983 = vmatmul.mubr.bf16.gmra.mxu0 %v1658_v20 }
 0x2be   :  { %v2941_v23 = vpop.f32.mrf.mxu1 }
 0x2bf   :  { %v1660_v26 = vpack.c.bf16 %v2941_v23, %v2940_v21  ;;  %v2063_v21 = vld [vmem:[%s3707_s7 + $0x1] sm:$0x1]  ;;  %v1776_v23 = vpop.permute.xlu0 %1775 }
 0x2c0   :  { %v1633_v24 = vpop.f32.mrf.mxu1 }
 0x2c1   :  { %v1659_v25 = vpack.c.bf16 %v1633_v24, %v1630_v22 }
 0x2c3   :  { %2986 = vmatprep.mubr.bf16.mxu0 %v1659_v25 }
 0x2c4   :  { %2987 = vmatmul.mubr.bf16.gmra.mxu0 %v1660_v26  ;;  %v1781_v26 = vpop.permute.xlu1 %1780 }
 0x2c5   :  { %3070 = vmatprep.mubr.msk.bf16.mxu0 %vm3143_vm2, %v3142_v27 }
 0x34c   :  { %v2960_v38 = vpop.f32.mrf.mxu0 }
 0x34d   :  { %v1896_v42 = vadd.f32 %v2960_v38, %v1706_v28 }
 0x34e   :  { %v1887_v41 = vpop.f32.mrf.mxu0 }
 0x34f   :  { %v2016_v47 = vmax.f32 %v1896_v42, 0.0  ;;  %v1888_v48 = vadd.f32 %v1887_v41, %v1696_v30  ;;  %v1811_v41 = vpop.permute.xlu1 %1810 }
 0x350   :  { %v2961_v43 = vpop.f32.mrf.mxu0 }
 0x351   :  { %v1899_v44 = vadd.f32 %v2961_v43, %v1711_v29  ;;  %v2014_v12 = vmax.f32 %v1888_v48, 0.0 }
 0x352   :  { %v1890_v45 = vpop.f32.mrf.mxu0 }
 0x353   :  { %v2017_v7 = vmax.f32 %v1899_v44, 0.0  ;;  %v1891_v49 = vadd.f32 %v1890_v45, %v1701_v31 }
 0x354   :  { %v2964_v51 = vpop.f32.mrf.mxu0 }
 0x355   :  { %v2047_v52 = vpack.c.bf16 %v2017_v7, %v2016_v47  ;;  %v2015_v53 = vmax.f32 %v1891_v49, 0.0  ;;  %v1912_v55 = vadd.f32 %v2964_v51, %v1726_v32  ;;  %v1801_v51 = vpop.permute.xlu1 %1800 }
 0x356   :  { %v1903_v54 = vpop.f32.mrf.mxu0 }
 0x357   :  { %2991 = vmatpush3.bf16.msra.mxu1 %v2047_v52  ;;  %v2046_v57 = vpack.c.bf16 %v2015_v53, %v2014_v12  ;;  %v2020_v61 = vmax.f32 %v1912_v55, 0.0  ;;  %v1904_v62 = vadd.f32 %v1903_v54, %v1716_v34 }
 0x358   :  { %v2965_v15 = vpop.f32.mrf.mxu0  ;;  %2992 = vmatprep.subr.bf16.mxu1 %v3142_v27 }
 0x359   :  { %v1915_v58 = vadd.f32 %v2965_v15, %v1731_v33  ;;  %v2018_v8 = vmax.f32 %v1904_v62, 0.0  ;;  %v2065_v15 = vld [vmem:[%s3707_s7 + $0x3] sm:$0x1] }
 0x35a   :  { %v1906_v60 = vpop.f32.mrf.mxu0 }
 0x35b   :  { %v2021_v63 = vmax.f32 %v1915_v58, 0.0  ;;  %v1907_v0 = vadd.f32 %v1906_v60, %v1721_v35  ;;  %2993 = vmatpush3.bf16.msra.mxu1 %v2046_v57  ;;  %v1806_v35 = vpop.permute.xlu0 %1805 }
 0x35c   :  { %v2968_v2 = vpop.f32.mrf.mxu0  ;;  %2998 = vmatprep.subr.bf16.mxu1 %v3142_v27 }
 0x35d   :  { %v2049_v3 = vpack.c.bf16 %v2021_v63, %v2020_v61  ;;  %v2019_v4 = vmax.f32 %v1907_v0, 0.0  ;;  %v1928_v9 = vadd.f32 %v2968_v2, %v1746_v36  ;;  %v1831_v63 = vpop.permute.xlu1 %1830 }
 0x35e   :  { %v1919_v5 = vpop.f32.mrf.mxu0  ;;  %2995 = vmatmul.mubr.msk.bf16.vlgmr.msra.gmra.mxu1 %vm1134_vm1, %v2062_v1 }
 0x35f   :  { %2999 = vmatpush3.bf16.msra.mxu1 %v2049_v3  ;;  %3002 = vmatprep.mubr.msk.bf16.mxu1 %vm3143_vm2, %v3142_v27  ;;  %v2048_v13 = vpack.c.bf16 %v2019_v4, %v2018_v8  ;;  %v2024_v17 = vmax.f32 %v1928_v9, 0.0  ;;  %v1920_v18 = vadd.f32 %v1919_v5, %v1736_v39  ;;  %v1796_v7 = vpop.permute.xlu0 %1795  ;;  %v2066_v9 = vld [vmem:[%s3707_s7 + $0x4] sm:$0x1] }
 0x360   :  { %v2969_v11 = vpop.f32.mrf.mxu0  ;;  %3000 = vmatprep.subr.bf16.mxu1 %v3142_v27 }
 0x361   :  { %v1931_v14 = vadd.f32 %v2969_v11, %v1751_v37  ;;  %v2022_v29 = vmax.f32 %v1920_v18, 0.0 }
 0x362   :  { %v1922_v16 = vpop.f32.mrf.mxu0 }
 0x363   :  { %v2025_v19 = vmax.f32 %v1931_v14, 0.0  ;;  %v1923_v20 = vadd.f32 %v1922_v16, %v1741_v40  ;;  %3001 = vmatpush3.bf16.msra.mxu1 %v2048_v13  ;;  %v2064_v40 = vld [vmem:[%s3707_s7 + $0x2] sm:$0x1]  ;;  %v1826_v60 = vpop.permute.xlu0 %1825  ;;  %v1821_v16 = vpop.permute.xlu1 %1820 }
 0x364   :  { %v2972_v22 = vpop.f32.mrf.mxu0  ;;  %3006 = vmatprep.subr.bf16.mxu1 %v3142_v27 }
 0x365   :  { %v2051_v24 = vpack.c.bf16 %v2025_v19, %v2024_v17  ;;  %v2023_v25 = vmax.f32 %v1923_v20, 0.0  ;;  %v1944_v30 = vadd.f32 %v2972_v22, %v1766_v46 }
 0x366   :  { %v1935_v28 = vpop.f32.mrf.mxu0  ;;  %3003 = vmatmul.mubr.msk.bf16.vlgmr.msra.gmra.mxu1 %vm1134_vm1, %v2063_v21 }
 0x367   :  { %3007 = vmatpush3.bf16.msra.mxu1 %v2051_v24  ;;  %3010 = vmatprep.mubr.msk.bf16.mxu1 %vm3143_vm2, %v3142_v27  ;;  %v2050_v32 = vpack.c.bf16 %v2023_v25, %v2022_v29  ;;  %v2028_v36 = vmax.f32 %v1944_v30, 0.0  ;;  %v1936_v37 = vadd.f32 %v1935_v28, %v1756_v56  ;;  %v1816_v11 = vpop.permute.xlu0 %1815  ;;  %v2067_v30 = vld [vmem:[%s3707_s7 + $0x5] sm:$0x1] }
 0x368   :  { %v2973_v31 = vpop.f32.mrf.mxu0  ;;  %3008 = vmatprep.subr.bf16.mxu1 %v3142_v27 }
 0x369   :  { %v1947_v33 = vadd.f32 %v2973_v31, %v1771_v50  ;;  %v2026_v46 = vmax.f32 %v1936_v37, 0.0  ;;  %v1851_v31 = vpop.permute.xlu1 %1850 }
 0x36a   :  { %v1938_v34 = vpop.f32.mrf.mxu0 }
 0x36b   :  { %v2029_v38 = vmax.f32 %v1947_v33, 0.0  ;;  %v1939_v39 = vadd.f32 %v1938_v34, %v1761_v59  ;;  %3009 = vmatpush3.bf16.msra.mxu1 %v2050_v32  ;;  %v1846_v24 = vpop.permute.xlu0 %1845 }
 0x36c   :  { %v2976_v42 = vpop.f32.mrf.mxu0  ;;  %3014 = vmatprep.subr.bf16.mxu1 %v3142_v27 }
 0x36d   :  { %v2053_v43 = vpack.c.bf16 %v2029_v38, %v2028_v36  ;;  %v2027_v44 = vmax.f32 %v1939_v39, 0.0  ;;  %v1960_v47 = vadd.f32 %v2976_v42, %v1786_v6  ;;  %v1841_v42 = vpop.permute.xlu1 %1840 }
 0x36e   :  { %v1951_v45 = vpop.f32.mrf.mxu0  ;;  %3011 = vmatmul.mubr.msk.bf16.vlgmr.msra.gmra.mxu1 %vm1134_vm1, %v2064_v40 }
 0x36f   :  { %3015 = vmatpush3.bf16.msra.mxu1 %v2053_v43  ;;  %3018 = vmatprep.mubr.msk.bf16.mxu1 %vm3143_vm2, %v3142_v27  ;;  %v2052_v49 = vpack.c.bf16 %v2027_v44, %v2026_v46  ;;  %v2032_v53 = vmax.f32 %v1960_v47, 0.0  ;;  %v1952_v54 = vadd.f32 %v1951_v45, %v1776_v23  ;;  %v1836_v39 = vpop.permute.xlu0 %1835 }
 0x370   :  { %v2977_v48 = vpop.f32.mrf.mxu0  ;;  %3016 = vmatprep.subr.bf16.mxu1 %v3142_v27 }
 0x371   :  { %v1963_v50 = vadd.f32 %v2977_v48, %v1791_v10  ;;  %v2030_v61 = vmax.f32 %v1952_v54, 0.0  ;;  %v2068_v48 = vld [vmem:[%s3707_s7 + $0x6] sm:$0x1]  ;;  %v3128_v54 = vld [vmem:[%s3708_s2 + $0x30] sm:$0xff]  }
 0x372   :  { %v1954_v52 = vpop.f32.mrf.mxu0 }
 0x373   :  { %v2033_v12 = vmax.f32 %v1963_v50, 0.0  ;;  %v1955_v55 = vadd.f32 %v1954_v52, %v1781_v26  ;;  %3017 = vmatpush3.bf16.msra.mxu1 %v2052_v49  ;;  %v2069_v52 = vld [vmem:[%s3707_s7 + $0x7] sm:$0x1] }
 0x374   :  { %v2980_v56 = vpop.f32.mrf.mxu0  ;;  %3022 = vmatprep.subr.bf16.mxu1 %v3142_v27 }
 0x375   :  { %v2055_v57 = vpack.c.bf16 %v2033_v12, %v2032_v53  ;;  %v2031_v58 = vmax.f32 %v1955_v55, 0.0  ;;  %v1976_v62 = vadd.f32 %v2980_v56, %v1806_v35  ;;  %v3127_v53 = vld [vmem:[%s3708_s2 + $0x38] sm:$0xff]   ;;  %v3129_v12 = vld [vmem:[%s3708_s2 + $0x28] sm:$0xff]   ;;  %v3130_v55 = vld [vmem:[%s3708_s2 + $0x20] sm:$0xff]  }
 0x376   :  { %v1967_v59 = vpop.f32.mrf.mxu0  ;;  %3019 = vmatmul.mubr.msk.bf16.vlgmr.msra.gmra.mxu1 %vm1134_vm1, %v2065_v15  ;;  %3055 = vmatpush3.bf16.msra.mxu0 %v3127_v53  ;;  %v3131_v15 = vld [vmem:[%s3708_s2 + $0x18] sm:$0xff]   ;;  %v3132_v56 = vld [vmem:[%s3708_s2 + $0x10] sm:$0xff]  }
 0x377   :  { %3023 = vmatpush3.bf16.msra.mxu1 %v2055_v57  ;;  %3026 = vmatprep.mubr.msk.bf16.mxu1 %vm3143_vm2, %v3142_v27  ;;  %v2054_v1 = vpack.c.bf16 %v2031_v58, %v2030_v61  ;;  %v2036_v4 = vmax.f32 %v1976_v62, 0.0  ;;  %v1968_v5 = vadd.f32 %v1967_v59, %v1796_v7  ;;  %v3133_v57 = vld [vmem:[%s3708_s2 + $0x8] sm:$0xff]   ;;  %v3134_v58 = vld [vmem:[%s3708_s2] sm:$0xff]  }
 0x378   :  { %v2981_v0 = vpop.f32.mrf.mxu0  ;;  %3024 = vmatprep.subr.bf16.mxu1 %v3142_v27  ;;  %3056 = vmatprep.subr.bf16.mxu0 %v3142_v27 }
 0x379   :  { %v1979_v2 = vadd.f32 %v2981_v0, %v1811_v41  ;;  %v2034_v18 = vmax.f32 %v1968_v5, 0.0 }
 0x37a   :  { %v1970_v3 = vpop.f32.mrf.mxu0  ;;  %3057 = vmatpush3.bf16.msra.mxu0 %v3128_v54 }
 0x37b   :  { %v2037_v6 = vmax.f32 %v1979_v2, 0.0  ;;  %v1971_v8 = vadd.f32 %v1970_v3, %v1801_v51  ;;  %3025 = vmatpush3.bf16.msra.mxu1 %v2054_v1  ;;  %3058 = vmatprep.subr.bf16.mxu0 %v3142_v27 }
 0x37c   :  { %v2984_v10 = vpop.f32.mrf.mxu0  ;;  %3030 = vmatprep.subr.bf16.mxu1 %v3142_v27 }
 0x37d   :  { %v2057_v13 = vpack.c.bf16 %v2037_v6, %v2036_v4  ;;  %v2035_v14 = vmax.f32 %v1971_v8, 0.0  ;;  %v1992_v19 = vadd.f32 %v2984_v10, %v1826_v60 }
 0x37e   :  { %v1983_v17 = vpop.f32.mrf.mxu0  ;;  %3027 = vmatmul.mubr.msk.bf16.vlgmr.msra.gmra.mxu1 %vm1134_vm1, %v2066_v9  ;;  %3059 = vmatpush3.bf16.msra.mxu0 %v3129_v12 }
 0x37f   :  { %3031 = vmatpush3.bf16.msra.mxu1 %v2057_v13  ;;  %3034 = vmatprep.mubr.msk.bf16.mxu1 %vm3143_vm2, %v3142_v27  ;;  %v2056_v21 = vpack.c.bf16 %v2035_v14, %v2034_v18  ;;  %v2040_v25 = vmax.f32 %v1992_v19, 0.0  ;;  %v1984_v26 = vadd.f32 %v1983_v17, %v1816_v11 }
 0x380   :  { %v2985_v20 = vpop.f32.mrf.mxu0  ;;  %3032 = vmatprep.subr.bf16.mxu1 %v3142_v27  ;;  %3060 = vmatprep.subr.bf16.mxu0 %v3142_v27 }
 0x381   :  { %v1995_v22 = vadd.f32 %v2985_v20, %v1831_v63  ;;  %v2038_v36 = vmax.f32 %v1984_v26, 0.0 }
 0x382   :  { %v1986_v23 = vpop.f32.mrf.mxu0  ;;  %3061 = vmatpush3.bf16.msra.mxu0 %v3130_v55 }
 0x383   :  { %v2041_v28 = vmax.f32 %v1995_v22, 0.0  ;;  %v1987_v29 = vadd.f32 %v1986_v23, %v1821_v16  ;;  %3033 = vmatpush3.bf16.msra.mxu1 %v2056_v21  ;;  %3062 = vmatprep.subr.bf16.mxu0 %v3142_v27 }
 0x384   :  { %v2988_v32 = vpop.f32.mrf.mxu0  ;;  %3038 = vmatprep.subr.bf16.mxu1 %v3142_v27 }
 0x385   :  { %v2059_v33 = vpack.c.bf16 %v2041_v28, %v2040_v25  ;;  %v2039_v34 = vmax.f32 %v1987_v29, 0.0  ;;  %v2008_v37 = vadd.f32 %v2988_v32, %v1846_v24 }
 0x386   :  { %v1999_v35 = vpop.f32.mrf.mxu0  ;;  %3035 = vmatmul.mubr.msk.bf16.vlgmr.msra.gmra.mxu1 %vm1134_vm1, %v2067_v30  ;;  %3063 = vmatpush3.bf16.msra.mxu0 %v3131_v15 }
 0x387   :  { %3039 = vmatpush3.bf16.msra.mxu1 %v2059_v33  ;;  %3042 = vmatprep.mubr.msk.bf16.mxu1 %vm3143_vm2, %v3142_v27  ;;  %v2058_v40 = vpack.c.bf16 %v2039_v34, %v2038_v36  ;;  %v2044_v44 = vmax.f32 %v2008_v37, 0.0  ;;  %v2000_v45 = vadd.f32 %v1999_v35, %v1836_v39 }
 0x388   :  { %v2989_v38 = vpop.f32.mrf.mxu0  ;;  %3040 = vmatprep.subr.bf16.mxu1 %v3142_v27  ;;  %3064 = vmatprep.subr.bf16.mxu0 %v3142_v27 }
 0x389   :  { %v2011_v41 = vadd.f32 %v2989_v38, %v1851_v31  ;;  %v2042_v50 = vmax.f32 %v2000_v45, 0.0 }
 0x38a   :  { %v2002_v43 = vpop.f32.mrf.mxu0  ;;  %3065 = vmatpush3.bf16.msra.mxu0 %v3132_v56 }
 0x38b   :  { %v2045_v46 = vmax.f32 %v2011_v41, 0.0  ;;  %v2003_v47 = vadd.f32 %v2002_v43, %v1841_v42  ;;  %3041 = vmatpush3.bf16.msra.mxu1 %v2058_v40  ;;  %3066 = vmatprep.subr.bf16.mxu0 %v3142_v27 }
 0x38c   :  { %3046 = vmatprep.subr.bf16.mxu1 %v3142_v27 }
 0x38d   :  { %v2061_v7 = vpack.c.bf16 %v2045_v46, %v2044_v44  ;;  %v2043_v49 = vmax.f32 %v2003_v47, 0.0 }
 0x38e   :  { %3043 = vmatmul.mubr.msk.bf16.vlgmr.msra.gmra.mxu1 %vm1134_vm1, %v2068_v48  ;;  %3067 = vmatpush3.bf16.msra.mxu0 %v3133_v57 }
 0x38f   :  { %3047 = vmatpush3.bf16.msra.mxu1 %v2061_v7  ;;  %3050 = vmatprep.mubr.msk.bf16.mxu1 %vm3143_vm2, %v3142_v27  ;;  %v2060_v51 = vpack.c.bf16 %v2043_v49, %v2042_v50 }
 0x390   :  { %3048 = vmatprep.subr.bf16.mxu1 %v3142_v27  ;;  %3068 = vmatprep.subr.bf16.mxu0 %v3142_v27 }
 0x392   :  { %3069 = vmatpush3.bf16.msra.mxu0 %v3134_v58  ;;  %v2439_v58 = vstv %s3709_s8 }
 0x393   :  { %3049 = vmatpush3.bf16.msra.mxu1 %v2060_v51 }
 0x396   :  { %3051 = vmatmul.mubr.msk.bf16.vlgmr.msra.gmra.mxu1 %vm1134_vm1, %v2069_v52 }
 0x41e   :  { %v2107_v59 = vpop.f32.mrf.mxu1 }
 0x41f   :  { %v2414_v32 = vpack.c.bf16 %v2107_v59, %v2107_v59 }
 0x420   :  { %v2996_v60 = vpop.f32.mrf.mxu1 }
 0x421   :  { %v2448_v41 = vunpack.c.l.b16 %v2414_v32 }
 0x422   :  { %v2110_v61 = vpop.f32.mrf.mxu1 }
 0x424   :  { %v2997_v62 = vpop.f32.mrf.mxu1 }
 0x426   :  { %v2150_v63 = vpop.f32.mrf.mxu1 }
 0x427   :  { %v2415_v20 = vpack.c.bf16 %v2150_v63, %v2150_v63 }
 0x428   :  { %v3004_v0 = vpop.f32.mrf.mxu1 }
 0x429   :  { %v2449_v26 = vunpack.c.l.b16 %v2415_v20 }
 0x42a   :  { %v2153_v1 = vpop.f32.mrf.mxu1 }
 0x42b   :  { %v2456_v36 = vrot.slane %v2449_v26, 7 }
 0x42c   :  { %v3005_v2 = vpop.f32.mrf.mxu1 }
 0x42d   :  { %v2458_v45 = vsel %vm2457_vm3, %v2456_v36, %v2448_v41 }
 0x42e   :  { %v2193_v3 = vpop.f32.mrf.mxu1 }
 0x42f   :  { %v2416_v21 = vpack.c.bf16 %v2193_v3, %v2193_v3 }
 0x430   :  { %v3012_v4 = vpop.f32.mrf.mxu1 }
 0x431   :  { %v2450_v29 = vunpack.c.l.b16 %v2416_v21 }
 0x432   :  { %v2196_v5 = vpop.f32.mrf.mxu1 }
 0x433   :  { %v2459_v38 = vrot.slane %v2450_v29, 6 }
 0x434   :  { %v3013_v6 = vpop.f32.mrf.mxu1 }
 0x435   :  { %v2461_v48 = vsel %vm2460_vm4, %v2459_v38, %v2458_v45 }
 0x436   :  { %v2236_v8 = vpop.f32.mrf.mxu1 }
 0x437   :  { %v2417_v23 = vpack.c.bf16 %v2236_v8, %v2236_v8 }
 0x438   :  { %v3020_v9 = vpop.f32.mrf.mxu1 }
 0x439   :  { %v2451_v33 = vunpack.c.l.b16 %v2417_v23 }
 0x43a   :  { %v2239_v27 = vpop.f32.mrf.mxu1 }
 0x43b   :  { %v2462_v42 = vrot.slane %v2451_v33, 5 }
 0x43c   :  { %v3021_v10 = vpop.f32.mrf.mxu1 }
 0x43d   :  { %v2464_v50 = vsel %vm2463_vm5, %v2462_v42, %v2461_v48 }
 0x43e   :  { %v2279_v11 = vpop.f32.mrf.mxu1 }
 0x43f   :  { %v2418_v24 = vpack.c.bf16 %v2279_v11, %v2279_v11 }
 0x440   :  { %v3028_v13 = vpop.f32.mrf.mxu1 }
 0x441   :  { %v2452_v34 = vunpack.c.l.b16 %v2418_v24 }
 0x442   :  { %v2282_v14 = vpop.f32.mrf.mxu1 }
 0x443   :  { %v2465_v43 = vrot.slane %v2452_v34, 4 }
 0x444   :  { %v3029_v16 = vpop.f32.mrf.mxu1 }
 0x445   :  { %v2467_v52 = vsel %vm2466_vm6, %v2465_v43, %v2464_v50 }
 0x446   :  { %v2322_v17 = vpop.f32.mrf.mxu1 }
 0x447   :  { %v2419_v28 = vpack.c.bf16 %v2322_v17, %v2322_v17 }
 0x448   :  { %v3036_v18 = vpop.f32.mrf.mxu1 }
 0x449   :  { %v2453_v37 = vunpack.c.l.b16 %v2419_v28 }
 0x44a   :  { %v2325_v19 = vpop.f32.mrf.mxu1 }
 0x44b   :  { %v2468_v46 = vrot.slane %v2453_v37, 3 }
 0x44c   :  { %v3037_v22 = vpop.f32.mrf.mxu1 }
 0x44d   :  { %v2470_v54 = vsel %vm2469_vm7, %v2468_v46, %v2467_v52 }
 0x44e   :  { %v2365_v25 = vpop.f32.mrf.mxu1 }
 0x44f   :  { %v2420_v30 = vpack.c.bf16 %v2365_v25, %v2365_v25 }
 0x450   :  { %v3044_v31 = vpop.f32.mrf.mxu1 }
 0x451   :  { %v2454_v39 = vunpack.c.l.b16 %v2420_v30 }
 0x452   :  { %v2368_v35 = vpop.f32.mrf.mxu1 }
 0x453   :  { %v2471_v7 = vrot.slane %v2454_v39, 2 }
 0x454   :  { %v3045_v40 = vpop.f32.mrf.mxu1 }
 0x455   :  { %v2473_v55 = vsel %vm2472_vm8, %v2471_v7, %v2470_v54 }
 0x456   :  { %v2408_v44 = vpop.f32.mrf.mxu1 }
 0x457   :  { %v2421_v47 = vpack.c.bf16 %v2408_v44, %v2408_v44 }
 0x458   :  { %v3052_v49 = vpop.f32.mrf.mxu1 }
 0x459   :  { %v2455_v51 = vunpack.c.l.b16 %v2421_v47 }
 0x45a   :  { %v2411_v53 = vpop.f32.mrf.mxu1 }
 0x45b   :  { %v2474_v12 = vrot.slane %v2455_v51, 1 }
 0x45c   :  { %v3053_v15 = vpop.f32.mrf.mxu1 }
 0x45d   :  { %v2476_v56 = vsel %vm2475_vm9, %v2474_v12, %v2473_v55 }
 0x45e   :  { %v2477_v57 = vpack.c.b16 %v2476_v56, %v2476_v56 }
 0x460   :  { %3071 = vmatmul.mubr.bf16.vlgmr.msra.gmra.mxu0 %v2477_v57 }
 0x520   :  { %v2561_v59 = vpop.f32.mrf.mxu0 }
 0x521   :  { %v2562_v60 = vadd.f32 %v2561_v59, %v2439_v58 }
 0x522   :  { %v3072_v61 = vpop.f32.mrf.mxu0 }
 0x523   :  { %2568 = vst.msk [vmem:[%s3710_s9] sm:$0xff] %vm2567_vm10, %v2562_v60 }
 0x524   :  { %v2564_v62 = vpop.f32.mrf.mxu0 }
 0x526   :  { %v3073_v63 = vpop.f32.mrf.mxu0 }

</bundles_post_ra>
